<compile_context>
chip_gen: v6e
topology: v6e:2x2x1
jax: 0.10.0
libtpu: 0.0.40
codegen_flags: <defaults>
</compile_context>

<pallas_src>
import functools

import jax
import jax.numpy as jnp
from jax.experimental import pallas as pl
from jax.experimental.pallas import tpu as pltpu


# ---------------------------------------------------------------------------
# Per-generation tiling / numerics configuration
# ---------------------------------------------------------------------------

_GEN_CONFIGS = {
    #            pixel tile      scoped-VMEM cap        bf16 EUP sigmoid
    "v5e":     dict(sp_max=2048, vmem_limit=64 * 2**20, bf16_silu=False),
    "v6e":     dict(sp_max=2048, vmem_limit=64 * 2**20, bf16_silu=True),
    "v7x":     dict(sp_max=1024, vmem_limit=48 * 2**20, bf16_silu=True),
    "unknown": dict(sp_max=512,  vmem_limit=None,       bf16_silu=False),
}


def _tpu_generation():
    try:
        kind = jax.devices()[0].device_kind.lower()
    except Exception:
        return "unknown"
    if "v5 lite" in kind or "v5e" in kind or "v5lite" in kind:
        return "v5e"
    if "v6" in kind:
        return "v6e"
    if "v7" in kind or "7x" in kind:
        return "v7x"
    return "unknown"


def _round_up(x, m):
    return ((x + m - 1) // m) * m


# ---------------------------------------------------------------------------
# Kernels
# ---------------------------------------------------------------------------

def _conv_pool_kernel(patch_ref, wconv_ref, bconv_ref, pooled_ref, pool_acc,
                      *, num_pixels, sp, bf16_silu):
    """Grid = (batch, pixel_chunk).  Pixel chunks are the pooling reduction.

    patch_ref  : (1, KP, SP)   bf16  im2col patches, pixels on the lane axis
    wconv_ref  : (CSTEM, KP)   bf16  3x3 conv weight, taps packed into K (transposed)
    bconv_ref  : (CSTEM, 1)    f32
    pooled_ref : (1, CSTEM, 1) f32   global-average-pooled stem features (output)
    pool_acc   : (CSTEM, 1)    f32   VMEM scratch, pooling accumulator
    """
    s = pl.program_id(1)

    @pl.when(s == 0)
    def _init():
        pool_acc[...] = jnp.zeros_like(pool_acc)

    # Conv stem for this chunk: ONE lane-dense MXU matmul, K = 9*Cin (padded).
    conv = jnp.dot(wconv_ref[...], patch_ref[0],
                   preferred_element_type=jnp.float32)          # (CSTEM, SP) f32
    conv = conv + bconv_ref[...]

    # SiLU.  Sigmoid in bf16 on v6e/v7x (native bf16 EUP); f32 on v5e.
    if bf16_silu:
        sig = jax.nn.sigmoid(conv.astype(jnp.bfloat16)).astype(jnp.float32)
    else:
        sig = jax.nn.sigmoid(conv)
    act = conv * sig

    # cdiv grid: the final chunk is padded with unspecified lanes -> mask them
    # against the true pixel count (only emitted when a tail actually exists).
    if num_pixels % sp != 0:
        lane = jax.lax.broadcasted_iota(jnp.int32, (1, sp), 1)
        act = jnp.where(s * sp + lane < num_pixels, act, 0.0)

    # Incremental global-average-pool: only (CSTEM, 1) stays live across steps.
    pool_acc[...] += jnp.sum(act, axis=1, keepdims=True)

    @pl.when(s == pl.num_programs(1) - 1)
    def _finalize():
        pooled_ref[0] = pool_acc[...] * (1.0 / num_pixels)


def _head_kernel(pooled_ref, wemb_ref, bemb_ref, w1_ref, b1_ref, w2_ref, b2_ref,
                 emb_ref, proj_ref):
    """Grid-less call, M = batch: feature head + projection for the whole batch.

    Batching the three Linears over B (instead of M=1 matmuls in the per-image
    epilogue of the pixel loop) amortizes the MXU systolic fill, and -- because
    this call has no grid -- wemb/w1/w2 get exactly ONE VMEM buffer each, which
    keeps the big weights inside v7x's 64 MiB VMEM budget.
    """
    pooled = pooled_ref[...]                                    # (B, CSTEM) f32

    # Backbone feature head -> internal embedding (EfficientNet _fc == Identity).
    emb = jnp.dot(pooled.astype(jnp.bfloat16), wemb_ref[...],
                  preferred_element_type=jnp.float32) + bemb_ref[...]
    emb_ref[...] = emb

    # Projection head: Linear -> ReLU -> Linear (no dropout in the module).
    h = jnp.dot(emb.astype(jnp.bfloat16), w1_ref[...],
                preferred_element_type=jnp.float32) + b1_ref[...]
    h = jnp.maximum(h, 0.0)
    proj_ref[...] = jnp.dot(h.astype(jnp.bfloat16), w2_ref[...],
                            preferred_element_type=jnp.float32) + b2_ref[...]


# ---------------------------------------------------------------------------
# Host-side preprocessing + pallas_call wrapper
# ---------------------------------------------------------------------------

def _im2col_3x3_kmajor(x_nchw, k_pad):
    """NCHW image -> (B, k_pad, H*W) bf16 patches of a SAME stride-1 3x3 conv.

    bf16 end-to-end and K-major (pixels on the minor/lane axis): halves the
    pre-pass HBM writes vs. an f32 intermediate, keeps the stored operand
    lane-dense, and needs no NHWC transpose pass.  The zero K-pad rows are part
    of the same concatenate (no extra HBM pass).
    """
    B, Cin, H, W = x_nchw.shape
    x = jnp.pad(x_nchw.astype(jnp.bfloat16), ((0, 0), (0, 0), (1, 1), (1, 1)))
    taps = [x[:, :, dy:dy + H, dx:dx + W] for dy in range(3) for dx in range(3)]
    k_raw = 9 * Cin
    if k_pad > k_raw:
        taps.append(jnp.zeros((B, k_pad - k_raw, H, W), jnp.bfloat16))
    return jnp.concatenate(taps, axis=1).reshape(B, k_pad, H * W)


@functools.partial(jax.jit, static_argnames=("sp", "vmem_limit", "bf16_silu"))
def _image_embedding_impl(x_nchw, params, *, sp, vmem_limit, bf16_silu):
    B, Cin, H, W = x_nchw.shape
    num_pixels = H * W
    ns = int(pl.cdiv(num_pixels, sp))

    # bf16, K-major im2col patches; K padded to the bf16 sublane granule.
    k_raw = 9 * Cin
    k_pad = _round_up(k_raw, 16)
    patches = _im2col_3x3_kmajor(x_nchw, k_pad)                 # (B, KP, P) bf16

    # bf16 matmul operands; f32 accumulation happens on the MXU in-kernel.
    wconv_t = jnp.pad(params["wconv"].reshape(k_raw, -1),
                      ((0, k_pad - k_raw), (0, 0))).T.astype(jnp.bfloat16)
    bconv_t = params["bconv"].reshape(-1, 1).astype(jnp.float32)
    wemb = params["wemb"].astype(jnp.bfloat16)
    w1 = params["w1"].astype(jnp.bfloat16)
    w2 = params["w2"].astype(jnp.bfloat16)
    bemb = params["bemb"].astype(jnp.float32)
    b1 = params["b1"].astype(jnp.float32)
    b2 = params["b2"].astype(jnp.float32)

    cstem = wconv_t.shape[0]
    e_int = wemb.shape[1]
    e_proj = w2.shape[1]

    def _resident(shape):
        # Full-array block, constant index map -> DMA'd once, stays in VMEM.
        # Only the tiny conv weight/bias stay resident in the pipelined call;
        # the big Linear weights live in the grid-less head call below.
        return pl.BlockSpec(shape, lambda b, s: (0,) * len(shape))

    cp_kwargs = dict(dimension_semantics=("parallel", "arbitrary"))
    if vmem_limit is not None:
        cp_kwargs["vmem_limit_bytes"] = vmem_limit

    # --- Pass 1: conv stem + SiLU + global-average-pool (pipelined grid) -----
    pooled3 = pl.pallas_call(
        functools.partial(_conv_pool_kernel, num_pixels=num_pixels, sp=sp,
                          bf16_silu=bf16_silu),
        out_shape=jax.ShapeDtypeStruct((B, cstem, 1), jnp.float32),
        grid_spec=pltpu.PrefetchScalarGridSpec(
            num_scalar_prefetch=0,
            grid=(B, ns),
            in_specs=[
                pl.BlockSpec((1, k_pad, sp), lambda b, s: (b, 0, s)),
                _resident((cstem, k_pad)),
                _resident((cstem, 1)),
            ],
            out_specs=pl.BlockSpec((1, cstem, 1), lambda b, s: (b, 0, 0)),
            scratch_shapes=[pltpu.VMEM((cstem, 1), jnp.float32)],
        ),
        compiler_params=pltpu.CompilerParams(**cp_kwargs),
    )(patches, wconv_t, bconv_t)

    pooled = pooled3[:, :, 0]                                   # (B, CSTEM) f32

    # --- Pass 2: feature head + projection, batched over B (grid-less) -------
    emb, proj = pl.pallas_call(
        _head_kernel,
        out_shape=(jax.ShapeDtypeStruct((B, e_int), jnp.float32),
                   jax.ShapeDtypeStruct((B, e_proj), jnp.float32)),
    )(pooled, wemb, bemb, w1, b1, w2, b2)
    return emb, proj


def image_embedding_forward(x_nchw, params, sp=None):
    """Pallas forward of ImageEmbedding: returns (embedding, projection)."""
    _, _, H, W = x_nchw.shape
    num_pixels = H * W
    cfg = _GEN_CONFIGS[_tpu_generation()]
    max_sp = _round_up(num_pixels, 128)          # lane-dense pixel tile
    if sp is None:
        sp = cfg["sp_max"]
    sp = int(min(_round_up(int(sp), 128), max_sp))
    return _image_embedding_impl(x_nchw, params, sp=sp,
                                 vmem_limit=cfg["vmem_limit"],
                                 bf16_silu=cfg["bf16_silu"])


# ---------------------------------------------------------------------------
# Pure-JAX reference (same bf16-operand / f32-accum numerics), params, test
# ---------------------------------------------------------------------------

@functools.partial(jax.jit, static_argnames=("bf16_silu",))
def reference_forward(x_nchw, params, bf16_silu=False):
    B, Cin, H, W = x_nchw.shape
    k_raw = 9 * Cin
    patches = _im2col_3x3_kmajor(x_nchw, k_raw)                 # (B, K, P) bf16
    wconv = params["wconv"].reshape(k_raw, -1).astype(jnp.bfloat16)
    conv = jnp.einsum("bkp,kc->bpc", patches, wconv,
                      preferred_element_type=jnp.float32)
    conv = conv + params["bconv"]
    if bf16_silu:
        sig = jax.nn.sigmoid(conv.astype(jnp.bfloat16)).astype(jnp.float32)
    else:
        sig = jax.nn.sigmoid(conv)
    act = conv * sig
    pooled = jnp.mean(act, axis=1)                              # (B, CSTEM)
    emb = jnp.dot(pooled.astype(jnp.bfloat16),
                  params["wemb"].astype(jnp.bfloat16),
                  preferred_element_type=jnp.float32) + params["bemb"]
    h = jnp.maximum(
        jnp.dot(emb.astype(jnp.bfloat16), params["w1"].astype(jnp.bfloat16),
                preferred_element_type=jnp.float32) + params["b1"], 0.0)
    proj = jnp.dot(h.astype(jnp.bfloat16), params["w2"].astype(jnp.bfloat16),
                   preferred_element_type=jnp.float32) + params["b2"]
    return emb, proj


def init_params(key, cin, cstem, emb_dim, proj_dim):
    ks = jax.random.split(key, 8)
    s = 0.1
    return {
        # Stand-in backbone: 3x3 conv stem + feature head.
        "wconv": s * jax.random.normal(ks[0], (3, 3, cin, cstem), jnp.float32),
        "bconv": s * jax.random.normal(ks[1], (1, cstem), jnp.float32),
        "wemb":  s * jax.random.normal(ks[2], (cstem, emb_dim), jnp.float32),
        "bemb":  s * jax.random.normal(ks[3], (1, emb_dim), jnp.float32),
        # Projection head: Linear -> ReLU -> Linear.
        "w1":    s * jax.random.normal(ks[4], (emb_dim, proj_dim), jnp.float32),
        "b1":    s * jax.random.normal(ks[5], (1, proj_dim), jnp.float32),
        "w2":    s * jax.random.normal(ks[6], (proj_dim, proj_dim), jnp.float32),
        "b2":    s * jax.random.normal(ks[7], (1, proj_dim), jnp.float32),
    }


if __name__ == "__main__":
    key = jax.random.PRNGKey(0)
    kx1, kx2, kp = jax.random.split(key, 3)

    # Small shapes consistent with the module: RGB images, batch=2.
    B, Cin = 2, 3
    CSTEM = 128    # stand-in stem width (lane-dense)
    E_INT = 128    # stand-in for EfficientNet-b2's 1408-d internal embedding
    E_PROJ = 128   # stand-in for embedding_size=1024
    params = init_params(kp, Cin, CSTEM, E_INT, E_PROJ)
    bf16_silu = _GEN_CONFIGS[_tpu_generation()]["bf16_silu"]    # mirror kernel numerics

    # Case 1: 32x32 -> evenly divided pixel grid (no tail chunk).
    x1 = jax.random.normal(kx1, (B, Cin, 32, 32), jnp.float32)  # NCHW like PyTorch
    emb1, proj1 = image_embedding_forward(x1, params)
    jax.block_until_ready((emb1, proj1))
    emb1_r, proj1_r = reference_forward(x1, params, bf16_silu=bf16_silu)

    # Case 2: 20x20 with sp=128 -> cdiv grid (4 chunks) + masked 16-pixel tail.
    x2 = jax.random.normal(kx2, (B, Cin, 20, 20), jnp.float32)
    emb2, proj2 = image_embedding_forward(x2, params, sp=128)
    jax.block_until_ready((emb2, proj2))
    emb2_r, proj2_r = reference_forward(x2, params, bf16_silu=bf16_silu)

    assert emb1.shape == (B, E_INT) and proj1.shape == (B, E_PROJ)
    assert emb2.shape == (B, E_INT) and proj2.shape == (B, E_PROJ)
    for got, want in ((emb1, emb1_r), (proj1, proj1_r),
                      (emb2, emb2_r), (proj2, proj2_r)):
        assert jnp.all(jnp.isfinite(got))
        assert jnp.allclose(got, want, rtol=1e-2, atol=1e-2), (
            float(jnp.max(jnp.abs(got - want))))
    print("KERNEL_OK")
</pallas_src>

<mosaic_0001>
module attributes {stable_mosaic.version = 11 : i64} {
  func.func @_conv_pool_kernel(%arg0: i32, %arg1: i32, %arg2: memref<1x32x512xbf16, #tpu.memory_space<vmem>>, %arg3: memref<128x32xbf16, #tpu.memory_space<vmem>>, %arg4: memref<128x1xf32, #tpu.memory_space<vmem>>, %arg5: memref<1x128x1xf32, #tpu.memory_space<vmem>>, %arg6: memref<128x1xf32, #tpu.memory_space<vmem>>) attributes {dimension_semantics = [#tpu.dimension_semantics<parallel>, #tpu.dimension_semantics<arbitrary>], iteration_bounds = array<i64: 2, 2>, scalar_prefetch = 0 : i64, scratch_operands = 1 : i64, tpu.core_type = #tpu.core_type<tc>, window_params = [{transform_indices = @transform_0, window_bounds = array<i64: 1, 32, 512>}, {pipeline_mode = #tpu.pipeline_mode<synchronous>, transform_indices = @transform_1, window_bounds = array<i64: 128, 32>}, {pipeline_mode = #tpu.pipeline_mode<synchronous>, transform_indices = @transform_2, window_bounds = array<i64: 128, 1>}, {transform_indices = @transform_3, window_bounds = array<i64: 1, 128, 1>}]} {
    %c0_i32 = arith.constant 0 : i32
    %0 = arith.cmpi eq, %arg1, %c0_i32 : i32
    %1 = arith.extui %0 : i1 to i32
    %c0_i32_0 = arith.constant 0 : i32
    %2 = arith.cmpi ne, %1, %c0_i32_0 : i32
    scf.if %2 {
      %cst_14 = arith.constant 0.000000e+00 : f32
      %24 = vector.broadcast %cst_14 : f32 to vector<128x1xf32>
      %c0_15 = arith.constant 0 : index
      %c0_16 = arith.constant 0 : index
      %25 = vector.load %arg6[%c0_15, %c0_16] : memref<128x1xf32, #tpu.memory_space<vmem>>, vector<128x1xf32>
      tpu.vector_store %arg6[%c0_15, %c0_16], %24 {strides = array<i32>} : memref<128x1xf32, #tpu.memory_space<vmem>>, vector<128x1xf32>,
    } else {
    }
    %c0 = arith.constant 0 : index
    %c0_1 = arith.constant 0 : index
    %3 = vector.load %arg3[%c0, %c0_1] : memref<128x32xbf16, #tpu.memory_space<vmem>>, vector<128x32xbf16>
    %c0_2 = arith.constant 0 : index
    %c0_3 = arith.constant 0 : index
    %c0_4 = arith.constant 0 : index
    %4 = vector.load %arg2[%c0_2, %c0_3, %c0_4] : memref<1x32x512xbf16, #tpu.memory_space<vmem>>, vector<1x32x512xbf16>
    %5 = vector.shape_cast %4 : vector<1x32x512xbf16> to vector<32x512xbf16>
    %cst = arith.constant dense<0.000000e+00> : vector<128x512xf32>
    %6 = tpu.matmul %3, %5, %cst {dimension_numbers = #tpu.dot_dimension_numbers<[1], [0], [0], [1], [0, 0, 1, 1], [], []>} : vector<128x32xbf16>, vector<32x512xbf16>, vector<128x512xf32> -> vector<128x512xf32>
    %c0_5 = arith.constant 0 : index
    %c0_6 = arith.constant 0 : index
    %7 = vector.load %arg4[%c0_5, %c0_6] : memref<128x1xf32, #tpu.memory_space<vmem>>, vector<128x1xf32>
    %8 = vector.broadcast %7 : vector<128x1xf32> to vector<128x512xf32>
    %9 = arith.addf %6, %8 : vector<128x512xf32>
    %10 = arith.negf %9 : vector<128x512xf32>
    %11 = math.exp %10 : vector<128x512xf32>
    %cst_7 = arith.constant 1.000000e+00 : f32
    %12 = vector.broadcast %cst_7 : f32 to vector<128x512xf32>
    %13 = arith.addf %12, %11 : vector<128x512xf32>
    %14 = arith.divf %12, %13 : vector<128x512xf32>
    %15 = arith.mulf %9, %14 : vector<128x512xf32>
    %c0_8 = arith.constant 0 : index
    %c0_9 = arith.constant 0 : index
    %16 = vector.load %arg6[%c0_8, %c0_9] : memref<128x1xf32, #tpu.memory_space<vmem>>, vector<128x1xf32>
    %cst_10 = arith.constant dense<0.000000e+00> : vector<128xf32>
    %17 = vector.multi_reduction <add>, %15, %cst_10 [1] : vector<128x512xf32> to vector<128xf32>
    %18 = vector.shape_cast %17 : vector<128xf32> to vector<128x1xf32>
    %19 = arith.addf %16, %18 : vector<128x1xf32>
    %c0_11 = arith.constant 0 : index
    %c0_12 = arith.constant 0 : index
    %20 = vector.load %arg6[%c0_11, %c0_12] : memref<128x1xf32, #tpu.memory_space<vmem>>, vector<128x1xf32>
    tpu.vector_store %arg6[%c0_11, %c0_12], %19 {strides = array<i32>} : memref<128x1xf32, #tpu.memory_space<vmem>>, vector<128x1xf32>,
    %c1_i32 = arith.constant 1 : i32
    %21 = arith.cmpi eq, %arg1, %c1_i32 : i32
    %22 = arith.extui %21 : i1 to i32
    %c0_i32_13 = arith.constant 0 : i32
    %23 = arith.cmpi ne, %22, %c0_i32_13 : i32
    scf.if %23 {
      %c0_14 = arith.constant 0 : index
      %c0_15 = arith.constant 0 : index
      %24 = vector.load %arg6[%c0_14, %c0_15] : memref<128x1xf32, #tpu.memory_space<vmem>>, vector<128x1xf32>
      %cst_16 = arith.constant 9.765625E-4 : f32
      %25 = vector.broadcast %cst_16 : f32 to vector<128x1xf32>
      %26 = arith.mulf %24, %25 : vector<128x1xf32>
      %c0_17 = arith.constant 0 : index
      %c0_18 = arith.constant 0 : index
      %c0_19 = arith.constant 0 : index
      %27 = vector.load %arg5[%c0_17, %c0_18, %c0_19] : memref<1x128x1xf32, #tpu.memory_space<vmem>>, vector<1x128x1xf32>
      %28 = vector.shape_cast %27 : vector<1x128x1xf32> to vector<128x1xf32>
      %29 = vector.shape_cast %26 : vector<128x1xf32> to vector<1x128x1xf32>
      tpu.vector_store %arg5[%c0_17, %c0_18, %c0_19], %29 {strides = array<i32>} : memref<1x128x1xf32, #tpu.memory_space<vmem>>, vector<1x128x1xf32>,
    } else {
    }
    return
  }
  func.func @transform_0(%arg0: i32, %arg1: i32) -> (i32, i32, i32) {
    %c0_i32 = arith.constant 0 : i32
    %c0_i32_0 = arith.constant 0 : i32
    return %arg0, %c0_i32, %arg1 : i32, i32, i32
  }
  func.func @transform_1(%arg0: i32, %arg1: i32) -> (i32, i32) {
    %c0_i32 = arith.constant 0 : i32
    %c0_i32_0 = arith.constant 0 : i32
    %c0_i32_1 = arith.constant 0 : i32
    return %c0_i32, %c0_i32_0 : i32, i32
  }
  func.func @transform_2(%arg0: i32, %arg1: i32) -> (i32, i32) {
    %c0_i32 = arith.constant 0 : i32
    %c0_i32_0 = arith.constant 0 : i32
    %c0_i32_1 = arith.constant 0 : i32
    return %c0_i32, %c0_i32_0 : i32, i32
  }
  func.func @transform_3(%arg0: i32, %arg1: i32) -> (i32, i32, i32) {
    %c0_i32 = arith.constant 0 : i32
    %c0_i32_0 = arith.constant 0 : i32
    %c0_i32_1 = arith.constant 0 : i32
    return %arg0, %c0_i32, %c0_i32_0 : i32, i32, i32
  }
}

module attributes {stable_mosaic.version = 11 : i64} {
  func.func @_head_kernel(%arg0: memref<2x128xf32, #tpu.memory_space<vmem>>, %arg1: memref<128x128xbf16, #tpu.memory_space<vmem>>, %arg2: memref<1x128xf32, #tpu.memory_space<vmem>>, %arg3: memref<128x128xbf16, #tpu.memory_space<vmem>>, %arg4: memref<1x128xf32, #tpu.memory_space<vmem>>, %arg5: memref<128x128xbf16, #tpu.memory_space<vmem>>, %arg6: memref<1x128xf32, #tpu.memory_space<vmem>>, %arg7: memref<2x128xf32, #tpu.memory_space<vmem>>, %arg8: memref<2x128xf32, #tpu.memory_space<vmem>>) attributes {dimension_semantics = [], scalar_prefetch = 0 : i64, scratch_operands = 0 : i64, tpu.core_type = #tpu.core_type<tc>} {
    %c0 = arith.constant 0 : index
    %c0_0 = arith.constant 0 : index
    %0 = vector.load %arg0[%c0, %c0_0] : memref<2x128xf32, #tpu.memory_space<vmem>>, vector<2x128xf32>
    %1 = arith.truncf %0 : vector<2x128xf32> to vector<2x128xbf16>
    %c0_1 = arith.constant 0 : index
    %c0_2 = arith.constant 0 : index
    %2 = vector.load %arg1[%c0_1, %c0_2] : memref<128x128xbf16, #tpu.memory_space<vmem>>, vector<128x128xbf16>
    %cst = arith.constant dense<0.000000e+00> : vector<2x128xf32>
    %3 = tpu.matmul %1, %2, %cst {dimension_numbers = #tpu.dot_dimension_numbers<[1], [0], [0], [1], [0, 0, 1, 1], [], []>} : vector<2x128xbf16>, vector<128x128xbf16>, vector<2x128xf32> -> vector<2x128xf32>
    %c0_3 = arith.constant 0 : index
    %c0_4 = arith.constant 0 : index
    %4 = vector.load %arg2[%c0_3, %c0_4] : memref<1x128xf32, #tpu.memory_space<vmem>>, vector<1x128xf32>
    %5 = vector.broadcast %4 : vector<1x128xf32> to vector<2x128xf32>
    %6 = arith.addf %3, %5 : vector<2x128xf32>
    %c0_5 = arith.constant 0 : index
    %c0_6 = arith.constant 0 : index
    %7 = vector.load %arg7[%c0_5, %c0_6] : memref<2x128xf32, #tpu.memory_space<vmem>>, vector<2x128xf32>
    tpu.vector_store %arg7[%c0_5, %c0_6], %6 {strides = array<i32>} : memref<2x128xf32, #tpu.memory_space<vmem>>, vector<2x128xf32>,
    %8 = arith.truncf %6 : vector<2x128xf32> to vector<2x128xbf16>
    %c0_7 = arith.constant 0 : index
    %c0_8 = arith.constant 0 : index
    %9 = vector.load %arg3[%c0_7, %c0_8] : memref<128x128xbf16, #tpu.memory_space<vmem>>, vector<128x128xbf16>
    %cst_9 = arith.constant dense<0.000000e+00> : vector<2x128xf32>
    %10 = tpu.matmul %8, %9, %cst_9 {dimension_numbers = #tpu.dot_dimension_numbers<[1], [0], [0], [1], [0, 0, 1, 1], [], []>} : vector<2x128xbf16>, vector<128x128xbf16>, vector<2x128xf32> -> vector<2x128xf32>
    %c0_10 = arith.constant 0 : index
    %c0_11 = arith.constant 0 : index
    %11 = vector.load %arg4[%c0_10, %c0_11] : memref<1x128xf32, #tpu.memory_space<vmem>>, vector<1x128xf32>
    %12 = vector.broadcast %11 : vector<1x128xf32> to vector<2x128xf32>
    %13 = arith.addf %10, %12 : vector<2x128xf32>
    %cst_12 = arith.constant 0.000000e+00 : f32
    %14 = vector.broadcast %cst_12 : f32 to vector<2x128xf32>
    %15 = arith.maximumf %13, %14 : vector<2x128xf32>
    %16 = arith.truncf %15 : vector<2x128xf32> to vector<2x128xbf16>
    %c0_13 = arith.constant 0 : index
    %c0_14 = arith.constant 0 : index
    %17 = vector.load %arg5[%c0_13, %c0_14] : memref<128x128xbf16, #tpu.memory_space<vmem>>, vector<128x128xbf16>
    %cst_15 = arith.constant dense<0.000000e+00> : vector<2x128xf32>
    %18 = tpu.matmul %16, %17, %cst_15 {dimension_numbers = #tpu.dot_dimension_numbers<[1], [0], [0], [1], [0, 0, 1, 1], [], []>} : vector<2x128xbf16>, vector<128x128xbf16>, vector<2x128xf32> -> vector<2x128xf32>
    %c0_16 = arith.constant 0 : index
    %c0_17 = arith.constant 0 : index
    %19 = vector.load %arg6[%c0_16, %c0_17] : memref<1x128xf32, #tpu.memory_space<vmem>>, vector<1x128xf32>
    %20 = vector.broadcast %19 : vector<1x128xf32> to vector<2x128xf32>
    %21 = arith.addf %18, %20 : vector<2x128xf32>
    %c0_18 = arith.constant 0 : index
    %c0_19 = arith.constant 0 : index
    %22 = vector.load %arg8[%c0_18, %c0_19] : memref<2x128xf32, #tpu.memory_space<vmem>>, vector<2x128xf32>
    tpu.vector_store %arg8[%c0_18, %c0_19], %21 {strides = array<i32>} : memref<2x128xf32, #tpu.memory_space<vmem>>, vector<2x128xf32>,
    return
  }
}

</mosaic_0001>

<bundles_post_ra>
// kernel: _image_embedding_impl.3
= control target key start
LH: loop header
LB: loop body
LE: loop exit
PB: predicated region body
PF: predicated region fallthrough
CT: control target
= control target key end

     0   :  { %14 = vsyncpa [#allocation3], 0  ;;  %v585_v1 = vmov 0.0   ;;  %vm586_vm0 = vmmov 0   ;;  %s754_s0 = inlined_call_operand.vmem [shape: f32[2,128], index: 0, kind: input, shape index: {}]   ;;  %s755_s1 = inlined_call_operand.vmem [shape: bf16[128,128], index: 1, kind: input, shape index: {}]   ;;  %s756_s2 = inlined_call_operand.vmem [shape: f32[1,128], index: 2, kind: input, shape index: {}]   ;;  %s757_s3 = inlined_call_operand.vmem [shape: bf16[128,128], index: 3, kind: input, shape index: {}]   ;;  %s758_s4 = inlined_call_operand.vmem [shape: f32[1,128], index: 4, kind: input, shape index: {}]   ;;  %s759_s5 = inlined_call_operand.vmem [shape: bf16[128,128], index: 5, kind: input, shape index: {}]   ;;  %s760_s6 = inlined_call_operand.vmem [shape: f32[1,128], index: 6, kind: input, shape index: {}]   ;;  %s761_s7 = inlined_call_operand.hbm [shape: f32[2,128], index: 7, kind: output, shape index: {0}]   ;;  %s762_s8 = inlined_call_operand.hbm [shape: f32[2,128], index: 8, kind: output, shape index: {1}]  }
   0x1   :  { %v517_v0 = vld [vmem:[%s755_s1 + $0x38] sm:$0xff]   ;;  %453 = vmatprep.subr.bf16.mxu0 %v585_v1  ;;  %473 = vmatprep.subr.bf16.mxu1 %v585_v1  ;;  %v518_v2 = vld [vmem:[%s755_s1 + $0x30] sm:$0xff]   ;;  %v519_v3 = vld [vmem:[%s755_s1 + $0x28] sm:$0xff]  }
   0x2   :  { %454 = vmatpush3.bf16.msra.mxu0 %v517_v0  ;;  %469 = vmatprep.mubr.msk.bf16.mxu0 %vm586_vm0, %v585_v1  ;;  %v525_v4 = vld [vmem:[%s757_s3 + $0x38] sm:$0xff]   ;;  %v520_v5 = vld [vmem:[%s755_s1 + $0x20] sm:$0xff]   ;;  %v526_v6 = vld [vmem:[%s757_s3 + $0x30] sm:$0xff]  }
   0x3   :  { %455 = vmatprep.subr.bf16.mxu0 %v585_v1  ;;  %489 = vmatprep.mubr.msk.bf16.mxu1 %vm586_vm0, %v585_v1  ;;  %v521_v7 = vld [vmem:[%s755_s1 + $0x18] sm:$0xff]   ;;  %v527_v8 = vld [vmem:[%s757_s3 + $0x28] sm:$0xff]   ;;  %v522_v9 = vld [vmem:[%s755_s1 + $0x10] sm:$0xff]  }
   0x4   :  { %474 = vmatpush3.bf16.msra.mxu1 %v525_v4  ;;  %v528_v10 = vld [vmem:[%s757_s3 + $0x20] sm:$0xff]  }
   0x5   :  { %475 = vmatprep.subr.bf16.mxu1 %v585_v1 }
   0x6   :  { %456 = vmatpush3.bf16.msra.mxu0 %v518_v2 }
   0x7   :  { %457 = vmatprep.subr.bf16.mxu0 %v585_v1 }
   0x8   :  { %476 = vmatpush3.bf16.msra.mxu1 %v526_v6 }
   0x9   :  { %477 = vmatprep.subr.bf16.mxu1 %v585_v1 }
   0xa   :  { %458 = vmatpush3.bf16.msra.mxu0 %v519_v3 }
   0xb   :  { %459 = vmatprep.subr.bf16.mxu0 %v585_v1 }
   0xc   :  { %478 = vmatpush3.bf16.msra.mxu1 %v527_v8 }
   0xd   :  { %479 = vmatprep.subr.bf16.mxu1 %v585_v1 }
   0xe   :  { %460 = vmatpush3.bf16.msra.mxu0 %v520_v5 }
   0xf   :  { %461 = vmatprep.subr.bf16.mxu0 %v585_v1 }
  0x12   :  { %462 = vmatpush3.bf16.msra.mxu0 %v521_v7 }
  0x13   :  { %463 = vmatprep.subr.bf16.mxu0 %v585_v1 }
  0x14   :  { %15 = vsyncpa [#allocation5], 0  ;;  %v523_v11 = vld [vmem:[%s755_s1 + $0x8] sm:$0xff]   ;;  %480 = vmatpush3.bf16.msra.mxu1 %v528_v10  ;;  %v529_v12 = vld [vmem:[%s757_s3 + $0x18] sm:$0xff]   ;;  %s587_s11 = smov [#allocation2]  }
  0x15   :  { %481 = vmatprep.subr.bf16.mxu1 %v585_v1  ;;  %v524_v13 = vld [vmem:[%s755_s1] sm:$0xff]   ;;  %v530_v15 = vld [vmem:[%s757_s3 + $0x10] sm:$0xff]   ;;  %v531_v17 = vld [vmem:[%s757_s3 + $0x8] sm:$0xff]   ;;  %s377_s12 = sshll.u32 %s587_s11, 4  ;;  %s378_s12 = int_to_ptr.vmem [resolvable:$true] %s377_s12 }
  0x16   :  { %464 = vmatpush3.bf16.msra.mxu0 %v522_v9  ;;  %v31_v14 = vld [vmem:[%s754_s0] sm:$0x3]  ;;  %v533_v19 = vld [vmem:[%s759_s5 + $0x38] sm:$0xff]   ;;  %v534_v20 = vld [vmem:[%s759_s5 + $0x30] sm:$0xff]   ;;  %s541_s13 = scalar_lea.vmem %s378_s12, 32  ;;  %p546_p1 = scmp.lt.s32.totalorder %s378_s12, %s378_s12 }
  0x17   :  { %465 = vmatprep.subr.bf16.mxu0 %v585_v1  ;;  %v32_v16 = vpack.c.bf16 %v31_v14, %v31_v14  ;;  %v532_v18 = vld [vmem:[%s757_s3] sm:$0xff]   ;;  %v535_v21 = vld [vmem:[%s759_s5 + $0x28] sm:$0xff]   ;;  %v537_v23 = vld [vmem:[%s759_s5 + $0x18] sm:$0xff]   ;;  %p542_p0 = scmp.ne.s32.totalorder %s378_s12, %s541_s13  ;;  %p547_p2 = scmp.lt.s32.totalorder %s541_s13, %s541_s13 }
  0x18   :  { %482 = vmatpush3.bf16.msra.mxu1 %v529_v12  ;;  %v536_v22 = vld [vmem:[%s759_s5 + $0x20] sm:$0xff]   ;;  %v538_v24 = vld [vmem:[%s759_s5 + $0x10] sm:$0xff]   ;;  %v539_v32 = vld [vmem:[%s759_s5 + $0x8] sm:$0xff]  }
  0x19   :  { %483 = vmatprep.subr.bf16.mxu1 %v585_v1  ;;  %v399_v25 = vld [vmem:[%s756_s2] ss:$0 sm:$0xff]  ;;  %p548_p3 = por %p547_p2, %p546_p1 }
  0x1a   :  { %466 = vmatpush3.bf16.msra.mxu0 %v523_v11  ;;  %v540_v33 = vld [vmem:[%s759_s5] sm:$0xff]  }
  0x1b   :  { %467 = vmatprep.subr.bf16.mxu0 %v585_v1  ;;  %v408_v34 = vld [vmem:[%s758_s4] ss:$0 sm:$0xff]  ;;  %p549_p4 = pnand %p548_p3, %p542_p0 }
  0x1c   :  { %484 = vmatpush3.bf16.msra.mxu1 %v530_v15 }
  0x1d   :  { %485 = vmatprep.subr.bf16.mxu1 %v585_v1 }
  0x1e   :  { %468 = vmatpush3.bf16.msra.mxu0 %v524_v13 }
  0x1f   :  { %493 = vmatprep.subr.bf16.mxu0 %v585_v1 }
  0x20   :  { %486 = vmatpush3.bf16.msra.mxu1 %v531_v17 }
  0x21   :  { %470 = vmatmul.mubr.bf16.vlgmr.msra.gmra.mxu0 %v32_v16  ;;  %487 = vmatprep.subr.bf16.mxu1 %v585_v1 }
  0x22   :  { %509 = vmatprep.mubr.msk.bf16.mxu0 %vm586_vm0, %v585_v1  ;;  %494 = vmatpush3.bf16.msra.mxu0 %v533_v19 }
  0x23   :  { %495 = vmatprep.subr.bf16.mxu0 %v585_v1 }
  0x24   :  { %488 = vmatpush3.bf16.msra.mxu1 %v532_v18 }
  0x26   :  { %496 = vmatpush3.bf16.msra.mxu0 %v534_v20 }
  0x27   :  { %497 = vmatprep.subr.bf16.mxu0 %v585_v1 }
  0x2a   :  { %498 = vmatpush3.bf16.msra.mxu0 %v535_v21 }
  0x2b   :  { %499 = vmatprep.subr.bf16.mxu0 %v585_v1 }
  0x2e   :  { %500 = vmatpush3.bf16.msra.mxu0 %v536_v22 }
  0x2f   :  { %501 = vmatprep.subr.bf16.mxu0 %v585_v1 }
  0x32   :  { %502 = vmatpush3.bf16.msra.mxu0 %v537_v23 }
  0x33   :  { %503 = vmatprep.subr.bf16.mxu0 %v585_v1 }
  0x36   :  { %504 = vmatpush3.bf16.msra.mxu0 %v538_v24 }
  0x37   :  { %505 = vmatprep.subr.bf16.mxu0 %v585_v1 }
  0x3a   :  { %506 = vmatpush3.bf16.msra.mxu0 %v539_v32 }
  0x3b   :  { %507 = vmatprep.subr.bf16.mxu0 %v585_v1 }
  0x3e   :  { %508 = vmatpush3.bf16.msra.mxu0 %v540_v33 }
  0xe1   :  { %v138_v26 = vpop.f32.mrf.mxu0 }
  0xe2   :  { %v139_v27 = vadd.f32 %v399_v25, %v138_v26 }
  0xe3   :  { %v471_v28 = vpop.f32.mrf.mxu0 }
  0xe4   :  { %v145_v29 = vpack.c.bf16 %v139_v27, %v139_v27  ;;  %144 = vst [vmem:[#allocation2] sm:$0x3] %v139_v27 }
  0xe5   :  { %v141_v30 = vpop.f32.mrf.mxu0 }
  0xe6   :  { %490 = vmatmul.mubr.bf16.vlgmr.msra.gmra.mxu1 %v145_v29 }
  0xe7   :  { %v472_v31 = vpop.f32.mrf.mxu0 }
 0x1a6   :  { %v251_v35 = vpop.f32.mrf.mxu1 }
 0x1a7   :  { %v252_v36 = vadd.f32 %v408_v34, %v251_v35 }
 0x1a8   :  { %v491_v37 = vpop.f32.mrf.mxu1 }
 0x1a9   :  { %v257_v38 = vmax.f32 %v252_v36, 0.0 }
 0x1aa   :  { %v254_v39 = vpop.f32.mrf.mxu1 }
 0x1ab   :  { %v258_v40 = vpack.c.bf16 %v257_v38, %v257_v38 }
 0x1ac   :  { %v492_v41 = vpop.f32.mrf.mxu1 }
 0x1ad   :  { %510 = vmatmul.mubr.bf16.vlgmr.msra.gmra.mxu0 %v258_v40 }
 0x1ae   :  { %552 = shalt.err (!%p549_p4)
}
 0x1af   :  { %380 = dma.vmem_to_hbm [thread:$0]  %s378_s12, 32, %s761_s7, [#allocation3]   ;;  %v417_v42 = vld [vmem:[%s760_s6] ss:$0 sm:$0xff] }
 0x1b0   :  { %s588_s1 = smov [#allocation4]  }
 0x1b1   :  { %s387_s15 = sshll.u32 %s588_s1, 4  ;;  %s388_s15 = int_to_ptr.vmem [resolvable:$true] %s387_s15 }
 0x1b2   :  { %s561_s16 = scalar_lea.vmem %s388_s15, 32  ;;  %p566_p6 = scmp.lt.s32.totalorder %s388_s15, %s388_s15 }
 0x1b3   :  { %p562_p5 = scmp.ne.s32.totalorder %s388_s15, %s561_s16  ;;  %p567_p7 = scmp.lt.s32.totalorder %s561_s16, %s561_s16 }
 0x1b5   :  { %p568_p8 = por %p567_p7, %p566_p6 }
 0x1b7   :  { %p569_p9 = pnand %p568_p8, %p562_p5 }
 0x26d   :  { %v364_v43 = vpop.f32.mrf.mxu0 }
 0x26e   :  { %v365_v44 = vadd.f32 %v417_v42, %v364_v43 }
 0x26f   :  { %v511_v45 = vpop.f32.mrf.mxu0 }
 0x270   :  { %370 = vst [vmem:[#allocation4] sm:$0x3] %v365_v44 }
 0x271   :  { %v367_v46 = vpop.f32.mrf.mxu0 }
 0x272   :  { %572 = shalt.err (!%p569_p9)
}
 0x273   :  { %390 = dma.vmem_to_hbm [thread:$0]  %s388_s15, 32, %s762_s8, [#allocation5]   ;;  %v512_v47 = vpop.f32.mrf.mxu0 }
 0x274   :  { %581 = dma.done.wait [#allocation3], 32  }
 0x275   :  { %582 = vsyncadd [#allocation3], 4294967264 }
 0x276   :  { %583 = dma.done.wait [#allocation5], 32  }
 0x277   :  { %584 = vsyncadd [#allocation5], 4294967264 }
 0x278   :  { %397 = vsyncpa [#allocation3], 1 }
 0x279   :  { %398 = vsyncpa [#allocation5], 1 }

// kernel: _image_embedding_impl.2
= control target key start
LH: loop header
LB: loop body
LE: loop exit
PB: predicated region body
PF: predicated region fallthrough
CT: control target
= control target key end

     0   :  { %s1926_s12 = smov 0   ;;  %s1928_s13 = smov 0   ;;  %s2494_s0 = inlined_call_operand.vmem [shape: bf16[2,32,1024], index: 0, kind: input, shape index: {}]   ;;  %s2495_s1 = inlined_call_operand.vmem [shape: bf16[128,32], index: 1, kind: input, shape index: {}]   ;;  %s2496_s2 = inlined_call_operand.vmem [shape: f32[128,1], index: 2, kind: input, shape index: {}]   ;;  %s2497_s3 = inlined_call_operand.vmem [shape: f32[2,128,1], index: 3, kind: output, shape index: {}]  }
   0x1   :  { %s1930_s14 = smov 0   ;;  %s1932_s15 = smov 0  }
   0x2   :  { %s1934_s16 = smov 0   ;;  %s1936_s17 = smov 0  }
   0x3   :  { %s1938_s18 = smov 0  }
   0x4 LB: > { %s22_s19 = sadd.s32 1, %s1894_s16  ;;  %s25_s20 = sadd.s32 1, %s1898_s17  ;;  %s1902_s18 = sphi %s1938_s18, %s13_s18   ;;  %s1898_s17 = sphi %s1936_s17, %s2503_s17   ;;  %s1894_s16 = sphi %s1934_s16, %s2502_s16   ;;  %s1890_s15 = sphi %s1932_s15, %s2501_s15   ;;  %s1886_s14 = sphi %s1930_s14, %s2500_s14   ;;  %s1882_s13 = sphi %s1928_s13, %s2499_s13   ;;  %s1878_s12 = sphi %s1926_s12, %s2498_s12  }
   0x5   : > { %p23_p0 = scmp.ge.s32.totalorder %s22_s19, 2  ;;  %p41_p1 = scmp.ne.s32.totalorder %s1882_s13, %s1878_s12 }
   0x6   : > { %p42_p2 = scmp.eq.s32.totalorder %s1902_s18, 0  ;;  %s34_s24 = sadd.s32 1, %s1882_s13 }
   0x7   : > { %s2505_s19 = smov (%p23_p0, %s22_s19), 0  ;;  %s2507_s20 = smov (!%p23_p0, %s25_s20), %s1898_s17 }
   0x8   : > { %p43_p3 = por %p42_p2, %p41_p1  ;;  %p27_p4 = scmp.ge.s32.totalorder %s2507_s20, 2 }
   0x9   : > { %s30_s21 = ssub.s32 %s1894_s16, %s2505_s19  ;;  %p1402_p6 = scmp.ge.s32.totalorder %s1902_s18, 4 }
   0xa   : > { %s2509_s20 = smov (%p27_p4, %s2507_s20), 0 }
   0xb   : > { %s29_s22 = ssub.s32 %s1898_s17, %s2509_s20  ;;  %141 = sbr.rel (%p1402_p6) target bundleno = 27 (0x1b), region = 24 }
   0xc   : > { %s31_s23 = sor.u32 %s30_s21, %s29_s22 }
   0xd   : > { %p32_p5 = scmp.eq.s32.totalorder %s31_s23, 0 }
   0xf   : > { %s1977_s25 = scalar_select %p32_p5, %s1882_s13, %s34_s24  }
  0x10   : > { %144 = sbr.rel (!%p43_p3) target bundleno = 27 (0x1b), region = 28  ;;  %s146_s26 = sand.u32 (%p43_p3), 1, %s1882_s13  }
  0x11   : > { %s1404_s27 = sshll.u32 (%p43_p3), %s1894_s16, 2  ;;  %s1403_s28 = sshll.u32 (%p43_p3), %s146_s26, 6 }
  0x12   : > { %s1405_s29 = sshll.u32 (%p43_p3), %s1898_s17, 5  ;;  %s148_s8 = scalar_lea.vmem (%p43_p3), [#allocation3], %s1403_s28 }
  0x13   : > { %s151_s30 = sadd.s32 (%p43_p3), %s1405_s29, %s1404_s27 }
  0x14   : > { %s1406_s4 = sshll.u32 (%p43_p3), %s151_s30, 2 }
  0x15   : > { %s153_s7 = scalar_lea.vmem %s2494_s0, %s1406_s4 }
  0x16   : > { %v166_v0 = vld [vmem:[%s153_s7] sm:$0xff]  ;;  %v168_v1 = vld [vmem:[%s153_s7 + $0x8] sm:$0xff] }
  0x17   : > { %v170_v2 = vld [vmem:[%s153_s7 + $0x20] sm:$0xff]  ;;  %167 = vst [vmem:[%s148_s8] sm:$0xff] %v166_v0  ;;  %169 = vst [vmem:[%s148_s8 + $0x8] sm:$0xff] %v168_v1  ;;  %v172_v3 = vld [vmem:[%s153_s7 + $0x28] sm:$0xff] }
  0x18   : > { %171 = vst [vmem:[%s148_s8 + $0x10] sm:$0xff] %v170_v2  ;;  %v174_v4 = vld [vmem:[%s153_s7 + $0x40] sm:$0xff]  ;;  %v176_v5 = vld [vmem:[%s153_s7 + $0x48] sm:$0xff]  ;;  %173 = vst [vmem:[%s148_s8 + $0x18] sm:$0xff] %v172_v3 }
  0x19   : > { %175 = vst [vmem:[%s148_s8 + $0x20] sm:$0xff] %v174_v4  ;;  %177 = vst [vmem:[%s148_s8 + $0x28] sm:$0xff] %v176_v5  ;;  %v178_v6 = vld [vmem:[%s153_s7 + $0x60] sm:$0xff]  ;;  %v180_v7 = vld [vmem:[%s153_s7 + $0x68] sm:$0xff] }
  0x1a   : > { %179 = vst [vmem:[%s148_s8 + $0x30] sm:$0xff] %v178_v6  ;;  %181 = vst [vmem:[%s148_s8 + $0x38] sm:$0xff] %v180_v7 }
  0x1b PF: > { %p1407_p7 = scmp.ge.s32.totalorder %s1902_s18, 1  ;;  %p186_p8 = scmp.lt.s32.totalorder %s1902_s18, 5 }
  0x1d   : > { %p187_p9 = pnand %p1407_p7, %p186_p8 }
  0x1e   : > { %s193_s9 = sand.u32 (!%p187_p9), 1, %s1878_s12   ;;  %p217_p10 = scmp.lt.s32.totalorder (!%p187_p9), %s1890_s15, 1 }
  0x1f   : > { %190 = sbr.rel (%p187_p9) target bundleno = 558 (0x22e), region = 51  ;;  %s1408_s10 = sshll.u32 (!%p187_p9), %s193_s9, 6 }
  0x20   : > { %s1996_s24 = scalar_lea.vmem (!%p187_p9), [#allocation3], %s1408_s10  ;;  %p1411_p11 = scmp.ne.s32.totalorder (!%p187_p9), %s1886_s14, 0 }
  0x24   : > { %s2511_s15 = smov (!%p217_p10, %s1890_s15), 1  ;;  %226 = sbr.rel (%p1411_p11) target bundleno = 50 (0x32), region = 59 }
  0x25   : > { %s1511_s11 = sshll.u32 %s2511_s15, 7 }
  0x26   : > { %s1994_s23 = scalar_lea.vmem %s2497_s3, %s1511_s11 }
  0x29   : > { %vm227_vm0 = vcmask 7168   ;;  %v1904_v8 = vmov 0.0  }
  0x2a   : > { %228 = vst.msk [vmem:[#allocation2] sm:$0xff] %vm227_vm0, %v1904_v8  ;;  %229 = vst.msk [vmem:[#allocation2 + $0x8] sm:$0xff] %vm227_vm0, %v1904_v8 }
  0x2b   : > { %230 = vst.msk [vmem:[#allocation2 + $0x10] sm:$0xff] %vm227_vm0, %v1904_v8  ;;  %231 = vst.msk [vmem:[#allocation2 + $0x18] sm:$0xff] %vm227_vm0, %v1904_v8 }
  0x2c   : > { %232 = vst.msk [vmem:[#allocation2 + $0x20] sm:$0xff] %vm227_vm0, %v1904_v8  ;;  %233 = vst.msk [vmem:[#allocation2 + $0x28] sm:$0xff] %vm227_vm0, %v1904_v8 }
  0x2d   : > { %234 = vst.msk [vmem:[#allocation2 + $0x30] sm:$0xff] %vm227_vm0, %v1904_v8  ;;  %235 = vst.msk [vmem:[#allocation2 + $0x38] sm:$0xff] %vm227_vm0, %v1904_v8 }
  0x2e   : > { %236 = vst.msk [vmem:[#allocation2 + $0x40] sm:$0xff] %vm227_vm0, %v1904_v8  ;;  %237 = vst.msk [vmem:[#allocation2 + $0x48] sm:$0xff] %vm227_vm0, %v1904_v8 }
  0x2f   : > { %238 = vst.msk [vmem:[#allocation2 + $0x50] sm:$0xff] %vm227_vm0, %v1904_v8  ;;  %239 = vst.msk [vmem:[#allocation2 + $0x58] sm:$0xff] %vm227_vm0, %v1904_v8 }
  0x30   : > { %240 = vst.msk [vmem:[#allocation2 + $0x60] sm:$0xff] %vm227_vm0, %v1904_v8  ;;  %241 = vst.msk [vmem:[#allocation2 + $0x68] sm:$0xff] %vm227_vm0, %v1904_v8 }
  0x31   : > { %242 = vst.msk [vmem:[#allocation2 + $0x70] sm:$0xff] %vm227_vm0, %v1904_v8  ;;  %243 = vst.msk [vmem:[#allocation2 + $0x78] sm:$0xff] %vm227_vm0, %v1904_v8 }
  0x32 PF: > { %v1572_v9 = vld [vmem:[%s1996_s24 + $0x24] ss:$16 sps:$4 sm:$0xff]   ;;  %v1574_v10 = vld [vmem:[%s1996_s24 + $0x2c] ss:$16 sps:$4 sm:$0xff]   ;;  %v1905_v11 = vmov 0   ;;  %vm444_vm1 = vcmask 261120  }
  0x33   : > { %501 = vmatprep.mubr.bf16.mxu0 %v1905_v11  ;;  %614 = vmatprep.mubr.bf16.mxu1 %v1905_v11  ;;  %v1576_v12 = vld [vmem:[%s1996_s24 + $0x20] ss:$16 sps:$4 sm:$0xff]   ;;  %v1577_v13 = vld [vmem:[%s1996_s24 + $0x28] ss:$16 sps:$4 sm:$0xff]   ;;  %v1578_v14 = vld [vmem:[%s1996_s24 + $0x4] ss:$16 sps:$4 sm:$0xff]  }
  0x34   : > { %481 = vmatprep.subr.bf16.mxu0 %v1572_v9  ;;  %1570 = vset.pattern.permute.xlu0 %v1905_v11  ;;  %v1580_v15 = vld [vmem:[%s1996_s24 + $0xc] ss:$16 sps:$4 sm:$0xff]   ;;  %v1582_v16 = vld [vmem:[%s1996_s24] ss:$16 sps:$4 sm:$0xff]   ;;  %v1583_v17 = vld [vmem:[%s1996_s24 + $0x8] ss:$16 sps:$4 sm:$0xff]  }
  0x35   : > { %594 = vmatprep.subr.bf16.mxu1 %v1574_v10  ;;  %1571 = vset.pattern.permute.xlu1 %v1905_v11  ;;  %v1584_v18 = vld [vmem:[%s2495_s1] sm:$0xff]   ;;  %v270_v20 = vld [vmem:[%s2496_s2 + $0x10] sm:$0xff]  ;;  %v1585_v21 = vld [vmem:[%s2495_s1 + $0x8] sm:$0xff]   ;;  %vm1255_vm2 = vcmask 7168   ;;  %p1508_p12 = scmp.ne.s32.totalorder %s1886_s14, 1 }
  0x36   : > { %482 = vmatpush1.bf16.msra.mxu0 %v1576_v12  ;;  %595 = vmatpush1.bf16.msra.mxu1 %v1577_v13  ;;  %v268_v19 = vld [vmem:[%s2496_s2] sm:$0xff]  ;;  %v269_v22 = vld [vmem:[%s2496_s2 + $0x8] sm:$0xff]  ;;  %v271_v23 = vld [vmem:[%s2496_s2 + $0x18] sm:$0xff] }
  0x37   : > { %483 = vmatprep.subr.bf16.mxu0 %v1578_v14  ;;  %596 = vmatprep.subr.bf16.mxu1 %v1580_v15  ;;  %v272_v24 = vld [vmem:[%s2496_s2 + $0x20] sm:$0xff]  ;;  %v273_v25 = vld [vmem:[%s2496_s2 + $0x28] sm:$0xff]  ;;  %v1586_v26 = vld [vmem:[%s2495_s1 + $0x10] sm:$0xff]  }
  0x38   : > { %286 = vperm.xlu0 %1570, %v268_v19   ;;  %296 = vperm.xlu1 %1571, %v270_v20   ;;  %v274_v27 = vld [vmem:[%s2496_s2 + $0x30] sm:$0xff]  ;;  %v275_v28 = vld [vmem:[%s2496_s2 + $0x38] sm:$0xff]  ;;  %v276_v29 = vld [vmem:[%s2496_s2 + $0x40] sm:$0xff] }
  0x39   : > { %v277_v30 = vld [vmem:[%s2496_s2 + $0x48] sm:$0xff]  ;;  %v1587_v31 = vld [vmem:[%s2495_s1 + $0x18] sm:$0xff]   ;;  %v278_v32 = vld [vmem:[%s2496_s2 + $0x50] sm:$0xff] }
  0x3a   : > { %484 = vmatpush1.bf16.msra.mxu0 %v1582_v16  ;;  %597 = vmatpush1.bf16.msra.mxu1 %v1583_v17  ;;  %v279_v33 = vld [vmem:[%s2496_s2 + $0x58] sm:$0xff]  ;;  %v280_v34 = vld [vmem:[%s2496_s2 + $0x60] sm:$0xff]  ;;  %v281_v35 = vld [vmem:[%s2496_s2 + $0x68] sm:$0xff] }
  0x3b   : > { %v1588_v36 = vld [vmem:[%s2495_s1 + $0x20] sm:$0xff]   ;;  %v282_v37 = vld [vmem:[%s2496_s2 + $0x70] sm:$0xff]  ;;  %v283_v38 = vld [vmem:[%s2496_s2 + $0x78] sm:$0xff] }
  0x3c   : > { %291 = vperm.xlu0 %1570, %v269_v22   ;;  %301 = vperm.xlu1 %1571, %v271_v23   ;;  %v1589_v39 = vld [vmem:[%s2495_s1 + $0x28] sm:$0xff]   ;;  %v1590_v40 = vld [vmem:[%s2495_s1 + $0x30] sm:$0xff]   ;;  %v1591_v41 = vld [vmem:[%s2495_s1 + $0x38] sm:$0xff]  }
  0x3d   : > { %1428 = vmatmul.mubr.msk.bf16.vlgmr.msra.gmra.mxu0 %vm444_vm1, %v1584_v18  ;;  %1436 = vmatmul.mubr.msk.bf16.vlgmr.msra.gmra.mxu1 %vm444_vm1, %v1584_v18 }
  0x3e   : > { %511 = vmatprep.mubr.bf16.mxu0 %v1905_v11  ;;  %624 = vmatprep.mubr.bf16.mxu1 %v1905_v11 }
  0x40   : > { %306 = vperm.xlu0 %1570, %v272_v24   ;;  %311 = vperm.xlu1 %1571, %v273_v25  }
  0x44   : > { %316 = vperm.xlu0 %1570, %v274_v27   ;;  %321 = vperm.xlu1 %1571, %v275_v28  }
  0x45   : > { %1429 = vmatmul.mubr.msk.bf16.gmra.mxu0 %vm444_vm1, %v1585_v21  ;;  %1437 = vmatmul.mubr.msk.bf16.gmra.mxu1 %vm444_vm1, %v1585_v21 }
  0x46   : > { %521 = vmatprep.mubr.bf16.mxu0 %v1905_v11  ;;  %634 = vmatprep.mubr.bf16.mxu1 %v1905_v11 }
  0x48   : > { %326 = vperm.xlu0 %1570, %v276_v29   ;;  %331 = vperm.xlu1 %1571, %v277_v30  }
  0x4c   : > { %336 = vperm.xlu0 %1570, %v278_v32   ;;  %341 = vperm.xlu1 %1571, %v279_v33  }
  0x4d   : > { %1430 = vmatmul.mubr.msk.bf16.gmra.mxu0 %vm444_vm1, %v1586_v26  ;;  %1438 = vmatmul.mubr.msk.bf16.gmra.mxu1 %vm444_vm1, %v1586_v26 }
  0x4e   : > { %531 = vmatprep.mubr.bf16.mxu0 %v1905_v11  ;;  %644 = vmatprep.mubr.bf16.mxu1 %v1905_v11 }
  0x50   : > { %346 = vperm.xlu0 %1570, %v280_v34   ;;  %351 = vperm.xlu1 %1571, %v281_v35  }
  0x54   : > { %356 = vperm.xlu0 %1570, %v282_v37   ;;  %361 = vperm.xlu1 %1571, %v283_v38  }
  0x55   : > { %1431 = vmatmul.mubr.msk.bf16.gmra.mxu0 %vm444_vm1, %v1587_v31  ;;  %1439 = vmatmul.mubr.msk.bf16.gmra.mxu1 %vm444_vm1, %v1587_v31 }
  0x56   : > { %541 = vmatprep.mubr.bf16.mxu0 %v1905_v11  ;;  %654 = vmatprep.mubr.bf16.mxu1 %v1905_v11 }
  0x5d   : > { %1432 = vmatmul.mubr.msk.bf16.gmra.mxu0 %vm444_vm1, %v1588_v36  ;;  %1440 = vmatmul.mubr.msk.bf16.gmra.mxu1 %vm444_vm1, %v1588_v36 }
  0x5e   : > { %551 = vmatprep.mubr.bf16.mxu0 %v1905_v11  ;;  %664 = vmatprep.mubr.bf16.mxu1 %v1905_v11 }
  0x65   : > { %1433 = vmatmul.mubr.msk.bf16.gmra.mxu0 %vm444_vm1, %v1589_v39  ;;  %1441 = vmatmul.mubr.msk.bf16.gmra.mxu1 %vm444_vm1, %v1589_v39 }
  0x66   : > { %561 = vmatprep.mubr.bf16.mxu0 %v1905_v11  ;;  %674 = vmatprep.mubr.bf16.mxu1 %v1905_v11 }
  0x6d   : > { %1434 = vmatmul.mubr.msk.bf16.gmra.mxu0 %vm444_vm1, %v1590_v40  ;;  %1442 = vmatmul.mubr.msk.bf16.gmra.mxu1 %vm444_vm1, %v1590_v40 }
  0x6e   : > { %571 = vmatprep.mubr.bf16.mxu0 %v1905_v11  ;;  %684 = vmatprep.mubr.bf16.mxu1 %v1905_v11 }
  0x75   : > { %1435 = vmatmul.mubr.msk.bf16.gmra.mxu0 %vm444_vm1, %v1591_v41  ;;  %1443 = vmatmul.mubr.msk.bf16.gmra.mxu1 %vm444_vm1, %v1591_v41 }
  0xb3   : > { %v287_v42 = vpop.permute.xlu0 %286  ;;  %v297_v59 = vpop.permute.xlu1 %296 }
  0xb7   : > { %v292_v47 = vpop.permute.xlu0 %291  ;;  %v302_v12 = vpop.permute.xlu1 %301 }
  0xfd   : > { %v503_v43 = vpop.f32.mrf.mxu0  ;;  %v616_v44 = vpop.f32.mrf.mxu1 }
  0xfe   : > { %v2129_v45 = vadd.f32 %v503_v43, %v287_v42  ;;  %v2131_v46 = vadd.f32 %v616_v44, %v287_v42 }
  0xff   : > { %v505_v48 = vpop.f32.mrf.mxu0  ;;  %v618_v49 = vpop.f32.mrf.mxu1 }
 0x100   : > { %v1444_v50 = vmul.f32 -1.442695, %v2129_v45  ;;  %v1446_v51 = vmul.f32 -1.442695, %v2131_v46  ;;  %v2135_v52 = vadd.f32 %v505_v48, %v287_v42  ;;  %v2137_v53 = vadd.f32 %v618_v49, %v287_v42 }
 0x101   : > { %v507_v54 = vpop.f32.mrf.mxu0  ;;  %v620_v55 = vpop.f32.mrf.mxu1 }
 0x102   : > { %1592 = vpow2.f32 %v1444_v50  ;;  %v1445_v56 = vmul.f32 -1.442695, %v2135_v52  ;;  %v1447_v57 = vmul.f32 -1.442695, %v2137_v53  ;;  %v2141_v58 = vadd.f32 %v507_v54, %v292_v47 }
 0x103   : > { %1594 = vpow2.f32 %v1446_v51  ;;  %v2143_v60 = vadd.f32 %v620_v55, %v292_v47  ;;  %v509_v61 = vpop.f32.mrf.mxu0  ;;  %v622_v62 = vpop.f32.mrf.mxu1 }
 0x104   : > { %1596 = vpow2.f32 %v1445_v56  ;;  %v1448_v63 = vmul.f32 -1.442695, %v2141_v58  ;;  %v2146_v0 = vadd.f32 %v509_v61, %v292_v47  ;;  %v2148_v1 = vadd.f32 %v622_v62, %v292_v47 }
 0x105   : > { %1598 = vpow2.f32 %v1447_v57  ;;  %v1450_v2 = vmul.f32 -1.442695, %v2143_v60  ;;  %v513_v3 = vpop.f32.mrf.mxu0  ;;  %v626_v4 = vpop.f32.mrf.mxu1 }
 0x106   : > { %1600 = vpow2.f32 %v1448_v63  ;;  %v1449_v5 = vmul.f32 -1.442695, %v2146_v0  ;;  %v1451_v6 = vmul.f32 -1.442695, %v2148_v1  ;;  %v2153_v7 = vadd.f32 %v513_v3, %v297_v59 }
 0x107   : > { %1602 = vpow2.f32 %v1450_v2  ;;  %v2155_v8 = vadd.f32 %v626_v4, %v297_v59  ;;  %v515_v9 = vpop.f32.mrf.mxu0  ;;  %v628_v10 = vpop.f32.mrf.mxu1 }
 0x108   : > { %1604 = vpow2.f32 %v1449_v5  ;;  %v1452_v11 = vmul.f32 -1.442695, %v2153_v7  ;;  %v2158_v13 = vadd.f32 %v515_v9, %v297_v59  ;;  %v2160_v14 = vadd.f32 %v628_v10, %v297_v59  ;;  %v307_v4 = vpop.permute.xlu0 %306 }
 0x109   : > { %1606 = vpow2.f32 %v1451_v6  ;;  %v1454_v15 = vmul.f32 -1.442695, %v2155_v8  ;;  %v517_v16 = vpop.f32.mrf.mxu0  ;;  %v630_v17 = vpop.f32.mrf.mxu1 }
 0x10a   : > { %1608 = vpow2.f32 %v1452_v11  ;;  %v1453_v18 = vmul.f32 -1.442695, %v2158_v13  ;;  %v1455_v19 = vmul.f32 -1.442695, %v2160_v14  ;;  %v2165_v20 = vadd.f32 %v517_v16, %v302_v12 }
 0x10b   : > { %1610 = vpow2.f32 %v1454_v15  ;;  %v2167_v21 = vadd.f32 %v630_v17, %v302_v12  ;;  %v519_v22 = vpop.f32.mrf.mxu0  ;;  %v632_v23 = vpop.f32.mrf.mxu1 }
 0x10c   : > { %1612 = vpow2.f32 %v1453_v18  ;;  %v1456_v24 = vmul.f32 -1.442695, %v2165_v20  ;;  %v2170_v25 = vadd.f32 %v519_v22, %v302_v12  ;;  %v2172_v26 = vadd.f32 %v632_v23, %v302_v12 }
 0x10d   : > { %1614 = vpow2.f32 %v1455_v19  ;;  %v1458_v27 = vmul.f32 -1.442695, %v2167_v21  ;;  %v523_v28 = vpop.f32.mrf.mxu0  ;;  %v636_v29 = vpop.f32.mrf.mxu1 }
 0x10e   : > { %1616 = vpow2.f32 %v1456_v24  ;;  %v1457_v30 = vmul.f32 -1.442695, %v2170_v25  ;;  %v1459_v31 = vmul.f32 -1.442695, %v2172_v26  ;;  %v2177_v9 = vadd.f32 %v523_v28, %v307_v4  ;;  %v312_v24 = vpop.permute.xlu1 %311 }
 0x10f   : > { %v1593_v32 = vpop.eup %1592  ;;  %1618 = vpow2.f32 %v1458_v27  ;;  %v525_v33 = vpop.f32.mrf.mxu0  ;;  %v2179_v15 = vadd.f32 %v636_v29, %v307_v4 }
 0x110   : > { %v638_v34 = vpop.f32.mrf.mxu1  ;;  %v1595_v35 = vpop.eup %1594  ;;  %v887_v36 = vadd.f32 1.0, %v1593_v32  ;;  %1620 = vpow2.f32 %v1457_v30  ;;  %v2181_v18 = vadd.f32 %v525_v33, %v307_v4 }
 0x111   : > { %v1597_v37 = vpop.eup %1596  ;;  %v889_v38 = vadd.f32 1.0, %v1595_v35  ;;  %1622 = vpow2.f32 %v1459_v31  ;;  %v527_v39 = vpop.f32.mrf.mxu0  ;;  %v2183_v27 = vadd.f32 %v638_v34, %v307_v4  ;;  %v1460_v31 = vmul.f32 -1.442695, %v2177_v9 }
 0x112   : > { %v1599_v40 = vpop.eup %1598  ;;  %1624 = vrcp.f32 %v887_v36  ;;  %v888_v41 = vadd.f32 1.0, %v1597_v37  ;;  %v640_v42 = vpop.f32.mrf.mxu1  ;;  %v2186_v32 = vadd.f32 %v527_v39, %v312_v24  ;;  %v1462_v33 = vmul.f32 -1.442695, %v2179_v15 }
 0x113   : > { %v1601_v43 = vpop.eup %1600  ;;  %1626 = vrcp.f32 %v889_v38  ;;  %v890_v44 = vadd.f32 1.0, %v1599_v40  ;;  %v529_v49 = vpop.f32.mrf.mxu0  ;;  %v2189_v37 = vadd.f32 %v640_v42, %v312_v24  ;;  %v1461_v34 = vmul.f32 -1.442695, %v2181_v18 }
 0x114   : > { %v1603_v47 = vpop.eup %1602  ;;  %1628 = vrcp.f32 %v888_v41  ;;  %v891_v48 = vadd.f32 1.0, %v1601_v43  ;;  %v642_v56 = vpop.f32.mrf.mxu1  ;;  %v2192_v40 = vadd.f32 %v529_v49, %v312_v24  ;;  %v1463_v39 = vmul.f32 -1.442695, %v2183_v27 }
 0x115   : > { %v1605_v50 = vpop.eup %1604  ;;  %1630 = vrcp.f32 %v890_v44  ;;  %v893_v51 = vadd.f32 1.0, %v1603_v47  ;;  %v533_v63 = vpop.f32.mrf.mxu0  ;;  %v2195_v47 = vadd.f32 %v642_v56, %v312_v24  ;;  %v1466_v49 = vmul.f32 -1.442695, %v2189_v37 }
 0x116   : > { %v1607_v54 = vpop.eup %1606  ;;  %1632 = vrcp.f32 %v891_v48  ;;  %v892_v55 = vadd.f32 1.0, %v1605_v50  ;;  %v646_v10 = vpop.f32.mrf.mxu1  ;;  %v1464_v50 = vmul.f32 -1.442695, %v2186_v32 }
 0x117   : > { %v1609_v57 = vpop.eup %1608  ;;  %1634 = vrcp.f32 %v893_v51  ;;  %v894_v59 = vadd.f32 1.0, %v1607_v54  ;;  %v535_v19 = vpop.f32.mrf.mxu0 }
 0x118   : > { %v1611_v61 = vpop.eup %1610  ;;  %1636 = vrcp.f32 %v892_v55  ;;  %v895_v62 = vadd.f32 1.0, %v1609_v57  ;;  %v648_v29 = vpop.f32.mrf.mxu1 }
 0x119   : > { %v1613_v2 = vpop.eup %1612  ;;  %1638 = vrcp.f32 %v894_v59  ;;  %v897_v3 = vadd.f32 1.0, %v1611_v61  ;;  %v537_v41 = vpop.f32.mrf.mxu0  ;;  %v1465_v59 = vmul.f32 -1.442695, %v2192_v40 }
 0x11a   : > { %v1615_v5 = vpop.eup %1614  ;;  %1640 = vrcp.f32 %v895_v62  ;;  %v896_v6 = vadd.f32 1.0, %v1613_v2  ;;  %v317_v44 = vpop.permute.xlu0 %316 }
 0x11b   : > { %v1617_v11 = vpop.eup %1616  ;;  %1642 = vrcp.f32 %v897_v3  ;;  %v898_v12 = vadd.f32 1.0, %v1615_v5  ;;  %v2198_v42 = vadd.f32 %v533_v63, %v317_v44  ;;  %v650_v51 = vpop.f32.mrf.mxu1  ;;  %v2201_v55 = vadd.f32 %v646_v10, %v317_v44 }
 0x11c   : > { %v1619_v16 = vpop.eup %1618  ;;  %1644 = vrcp.f32 %v896_v6  ;;  %v899_v17 = vadd.f32 1.0, %v1617_v11  ;;  %v2206_v56 = vadd.f32 %v535_v19, %v317_v44  ;;  %v539_v61 = vpop.f32.mrf.mxu0  ;;  %v1467_v63 = vmul.f32 -1.442695, %v2195_v47 }
 0x11d   : > { %v1621_v22 = vpop.eup %1620  ;;  %1646 = vrcp.f32 %v898_v12  ;;  %v901_v23 = vadd.f32 1.0, %v1619_v16  ;;  %v322_v2 = vpop.permute.xlu1 %321  ;;  %v2209_v3 = vadd.f32 %v648_v29, %v317_v44  ;;  %v1468_v6 = vmul.f32 -1.442695, %v2198_v42 }
 0x11e   : > { %v1623_v28 = vpop.eup %1622  ;;  %1648 = vrcp.f32 %v899_v17  ;;  %v900_v30 = vadd.f32 1.0, %v1621_v22  ;;  %v2213_v10 = vadd.f32 %v537_v41, %v322_v2  ;;  %v652_v11 = vpop.f32.mrf.mxu1  ;;  %v1470_v16 = vmul.f32 -1.442695, %v2201_v55 }
 0x11f   : > { %v1625_v35 = vpop.eup %1624  ;;  %1650 = vrcp.f32 %v901_v23  ;;  %v902_v36 = vadd.f32 1.0, %v1623_v28  ;;  %v2216_v17 = vadd.f32 %v650_v51, %v322_v2  ;;  %v1469_v23 = vmul.f32 -1.442695, %v2206_v56  ;;  %v543_v24 = vpop.f32.mrf.mxu0 }
 0x120   : > { %v1627_v38 = vpop.eup %1626  ;;  %1652 = vrcp.f32 %v900_v30  ;;  %v1079_v22 = vmul.f32 %v1625_v35, %v2129_v45  ;;  %v1471_v30 = vmul.f32 -1.442695, %v2209_v3 }
 0x121   : > { %v1629_v43 = vpop.eup %1628  ;;  %1654 = vrcp.f32 %v902_v36  ;;  %v1474_v41 = vmul.f32 -1.442695, %v2216_v17  ;;  %v1081_v44 = vmul.f32 %v1627_v38, %v2131_v46 }
 0x122   : > { %v1631_v48 = vpop.eup %1630  ;;  %1656 = vpow2.f32 %v1460_v31  ;;  %v1080_v5 = vmul.f32 %v1629_v43, %v2135_v52  ;;  %v2222_v52 = vadd.f32 %v539_v61, %v322_v2  ;;  %v2225_v31 = vadd.f32 %v652_v11, %v322_v2 }
 0x123   : > { %v1633_v54 = vpop.eup %1632  ;;  %1658 = vpow2.f32 %v1462_v33  ;;  %v1472_v33 = vmul.f32 -1.442695, %v2213_v10 }
 0x124   : > { %v2203_v57 = vpop.eup %1634  ;;  %1660 = vpow2.f32 %v1461_v34  ;;  %v1159_v36 = vadd.f32 %v1080_v5, %v1079_v22  ;;  %v656_v34 = vpop.f32.mrf.mxu1 }
 0x125   : > { %v1637_v62 = vpop.eup %1636  ;;  %1662 = vpow2.f32 %v1463_v39  ;;  %v1473_v39 = vmul.f32 -1.442695, %v2222_v52 }
 0x126   : > { %v1639_v4 = vpop.eup %1638  ;;  %1664 = vpow2.f32 %v1464_v50  ;;  %v1084_v35 = vmul.f32 %v1637_v62, %v2146_v0  ;;  %v2238_v50 = vpop.f32.mrf.mxu0  ;;  %v1082_v0 = vmul.f32 %v1631_v48, %v2137_v53  ;;  %v1160_v2 = vadd.f32 %v1159_v36, %v1081_v44 }
 0x127   : > { %v1641_v12 = vpop.eup %1640  ;;  %1666 = vpow2.f32 %v1466_v49  ;;  %v1083_v49 = vmul.f32 %v1633_v54, %v2141_v58  ;;  %v2245_v62 = vpop.f32.mrf.mxu1 }
 0x128   : > { %v2218_v19 = vpop.eup %1642  ;;  %1668 = vpow2.f32 %v1465_v59  ;;  %v1475_v59 = vmul.f32 -1.442695, %v2225_v31  ;;  %v2248_v58 = vpop.f32.mrf.mxu0  ;;  %v1161_v54 = vadd.f32 %v1160_v2, %v1082_v0  ;;  %v1087_v53 = vmul.f32 %v1641_v12, %v2153_v7 }
 0x129   : > { %v1645_v28 = vpop.eup %1644  ;;  %1670 = vpow2.f32 %v1467_v63  ;;  %v1164_v38 = vadd.f32 %v1084_v35, %v1083_v49 }
 0x12a   : > { %v2227_v29 = vpop.eup %1646  ;;  %1672 = vpow2.f32 %v1468_v6  ;;  %v1088_v63 = vmul.f32 %v1645_v28, %v2158_v13  ;;  %v660_v28 = vpop.f32.mrf.mxu1  ;;  %1162 = vadd.xlane.f32.xlu0 %v1161_v54 }
 0x12b   : > { %v2230_v45 = vpop.eup %1648  ;;  %1674 = vpow2.f32 %v1470_v16  ;;  %v1085_v16 = vmul.f32 %v2203_v57, %v2143_v60  ;;  %v549_v7 = vpop.f32.mrf.mxu0 }
 0x12c   : > { %v2234_v43 = vpop.eup %1650  ;;  %1676 = vpow2.f32 %v1469_v23  ;;  %v1086_v23 = vmul.f32 %v1639_v4, %v2148_v1  ;;  %v1169_v36 = vadd.f32 %v1088_v63, %v1087_v53  ;;  %v1089_v1 = vmul.f32 %v2218_v19, %v2155_v8  ;;  %v332_v53 = vpop.permute.xlu1 %331 }
 0x12d   : > { %v1653_v51 = vpop.eup %1652  ;;  %1678 = vpow2.f32 %v1471_v30  ;;  %v1091_v19 = vmul.f32 %v2230_v45, %v2165_v20 }
 0x12e   : > { %v2242_v61 = vpop.eup %1654  ;;  %1680 = vpow2.f32 %v1472_v33  ;;  %v327_v33 = vpop.permute.xlu0 %326 }
 0x12f   : > { %v1657_v46 = vpop.eup %1656  ;;  %1682 = vpow2.f32 %v1474_v41  ;;  %v1165_v41 = vadd.f32 %v1164_v38, %v1085_v16  ;;  %v2254_v57 = vadd.f32 %v543_v24, %v327_v33  ;;  %v2259_v2 = vadd.f32 %v656_v34, %v327_v33 }
 0x130   : > { %v1659_v5 = vpop.eup %1658  ;;  %v903_v6 = vadd.f32 1.0, %v1657_v46  ;;  %1684 = vpow2.f32 %v1473_v39  ;;  %v662_v46 = vpop.f32.mrf.mxu1  ;;  %v1090_v24 = vmul.f32 %v2227_v29, %v2160_v14 }
 0x131   : > { %v1661_v11 = vpop.eup %1660  ;;  %v905_v48 = vadd.f32 1.0, %v1659_v5  ;;  %1686 = vpow2.f32 %v1475_v59  ;;  %v1166_v39 = vadd.f32 %v1165_v41, %v1086_v23  ;;  %v1092_v59 = vmul.f32 %v1653_v51, %v2170_v25  ;;  %v553_v51 = vpop.f32.mrf.mxu0 }
 0x132   : > { %v1663_v22 = vpop.eup %1662  ;;  %1688 = vrcp.f32 %v903_v6  ;;  %v904_v13 = vadd.f32 1.0, %v1661_v11  ;;  %v1170_v5 = vadd.f32 %v1169_v36, %v1089_v1  ;;  %v1476_v25 = vmul.f32 -1.442695, %v2254_v57  ;;  %v666_v20 = vpop.f32.mrf.mxu1 }
 0x133   : > { %v1665_v30 = vpop.eup %1664  ;;  %1690 = vrcp.f32 %v905_v48  ;;  %v906_v35 = vadd.f32 1.0, %v1663_v22  ;;  %1167 = vadd.xlane.f32.xlu1 %v1166_v39  ;;  %v2267_v11 = vadd.f32 %v2238_v50, %v327_v33  ;;  %v1174_v16 = vadd.f32 %v1092_v59, %v1091_v19 }
 0x134   : > { %v1667_v44 = vpop.eup %1666  ;;  %1692 = vrcp.f32 %v904_v13  ;;  %v907_v60 = vadd.f32 1.0, %v1665_v30  ;;  %v1171_v14 = vadd.f32 %v1170_v5, %v1090_v24  ;;  %v1478_v22 = vmul.f32 -1.442695, %v2259_v2 }
 0x135   : > { %v1669_v12 = vpop.eup %1668  ;;  %1694 = vrcp.f32 %v906_v35  ;;  %v909_v4 = vadd.f32 1.0, %v1667_v44  ;;  %v2271_v13 = vadd.f32 %v2245_v62, %v327_v33  ;;  %v2274_v30 = vadd.f32 %v2248_v58, %v332_v53  ;;  %v555_v44 = vpop.f32.mrf.mxu0 }
 0x136   : > { %v1671_v49 = vpop.eup %1670  ;;  %1696 = vrcp.f32 %v907_v60  ;;  %v908_v0 = vadd.f32 1.0, %v1669_v12  ;;  %1172 = vadd.xlane.f32.xlu0 %v1171_v14  ;;  %v1093_v36 = vmul.f32 %v2234_v43, %v2167_v21  ;;  %v2278_v41 = vadd.f32 %v660_v28, %v332_v53  ;;  %v668_v21 = vpop.f32.mrf.mxu1 }
 0x137   : > { %v1673_v38 = vpop.eup %1672  ;;  %1698 = vrcp.f32 %v909_v4  ;;  %v910_v63 = vadd.f32 1.0, %v1671_v49  ;;  %v2280_v1 = vadd.f32 %v549_v7, %v332_v53  ;;  %v2282_v62 = vadd.f32 %v662_v46, %v332_v53  ;;  %v337_v4 = vpop.permute.xlu0 %336 }
 0x138   : > { %v1675_v8 = vpop.eup %1674  ;;  %1700 = vrcp.f32 %v908_v0  ;;  %v911_v6 = vadd.f32 1.0, %v1673_v38  ;;  %v1094_v58 = vmul.f32 %v2242_v61, %v2172_v26  ;;  %v1175_v43 = vadd.f32 %v1174_v16, %v1093_v36  ;;  %v557_v24 = vpop.f32.mrf.mxu0 }
 0x139   : > { %v1677_v34 = vpop.eup %1676  ;;  %1702 = vrcp.f32 %v910_v63  ;;  %v913_v54 = vadd.f32 1.0, %v1675_v8  ;;  %v1477_v59 = vmul.f32 -1.442695, %v2267_v11  ;;  %v2287_v0 = vadd.f32 %v553_v51, %v337_v4 }
 0x13a   : > { %v1679_v29 = vpop.eup %1678  ;;  %1704 = vrcp.f32 %v911_v6  ;;  %v912_v48 = vadd.f32 1.0, %v1677_v34  ;;  %v1479_v46 = vmul.f32 -1.442695, %v2271_v13  ;;  %v2290_v38 = vadd.f32 %v666_v20, %v337_v4 }
 0x13b   : > { %v1681_v45 = vpop.eup %1680  ;;  %1706 = vrcp.f32 %v913_v54  ;;  %v914_v23 = vadd.f32 1.0, %v1679_v29  ;;  %v1176_v26 = vadd.f32 %v1175_v43, %v1094_v58  ;;  %v1480_v63 = vmul.f32 -1.442695, %v2274_v30  ;;  %v670_v54 = vpop.f32.mrf.mxu1 }
 0x13c   : > { %v1683_v50 = vpop.eup %1682  ;;  %1708 = vrcp.f32 %v912_v48  ;;  %v915_v35 = vadd.f32 1.0, %v1681_v45  ;;  %v1482_v5 = vmul.f32 -1.442695, %v2278_v41  ;;  %v1481_v8 = vmul.f32 -1.442695, %v2280_v1 }
 0x13d   : > { %v1685_v60 = vpop.eup %1684  ;;  %1710 = vrcp.f32 %v914_v23  ;;  %v917_v12 = vadd.f32 1.0, %v1683_v50  ;;  %v1483_v34 = vmul.f32 -1.442695, %v2282_v62  ;;  %1177 = vadd.xlane.f32.xlu0 %v1176_v26  ;;  %v1484_v29 = vmul.f32 -1.442695, %v2287_v0 }
 0x13e   : > { %v1687_v33 = vpop.eup %1686  ;;  %1712 = vrcp.f32 %v915_v35  ;;  %v916_v39 = vadd.f32 1.0, %v1685_v60  ;;  %v2299_v16 = vadd.f32 %v555_v44, %v337_v4  ;;  %v2301_v53 = vadd.f32 %v668_v21, %v337_v4 }
 0x13f   : > { %v1689_v49 = vpop.eup %1688  ;;  %1714 = vrcp.f32 %v917_v12  ;;  %v918_v28 = vadd.f32 1.0, %v1687_v33 }
 0x140   : > { %v1691_v7 = vpop.eup %1690  ;;  %1716 = vrcp.f32 %v916_v39  ;;  %v1095_v6 = vmul.f32 %v1689_v49, %v2177_v9  ;;  %v342_v9 = vpop.permute.xlu1 %341  ;;  %v1485_v58 = vmul.f32 -1.442695, %v2299_v16  ;;  %v1487_v4 = vmul.f32 -1.442695, %v2301_v53 }
 0x141   : > { %v1693_v61 = vpop.eup %1692  ;;  %1718 = vrcp.f32 %v918_v28  ;;  %v1097_v20 = vmul.f32 %v1691_v7, %v2179_v15  ;;  %v2308_v36 = vadd.f32 %v670_v54, %v342_v9  ;;  %v672_v15 = vpop.f32.mrf.mxu1 }
 0x142   : > { %v1695_v19 = vpop.eup %1694  ;;  %v1096_v51 = vmul.f32 %v1693_v61, %v2181_v18  ;;  %1720 = vpow2.f32 %v1476_v25  ;;  %v1486_v18 = vmul.f32 -1.442695, %v2290_v38  ;;  %v559_v25 = vpop.f32.mrf.mxu0  ;;  %v2321_v7 = vadd.f32 %v672_v15, %v342_v9 }
 0x143   : > { %v1697_v14 = vpop.eup %1696  ;;  %1722 = vpow2.f32 %v1478_v22  ;;  %v1098_v50 = vmul.f32 %v1695_v19, %v2183_v27  ;;  %v2306_v22 = vadd.f32 %v557_v24, %v342_v9  ;;  %v2314_v27 = vadd.f32 %v559_v25, %v342_v9 }
 0x144   : > { %v1699_v48 = vpop.eup %1698  ;;  %v1179_v45 = vadd.f32 %v1096_v51, %v1095_v6  ;;  %1724 = vpow2.f32 %v1477_v59  ;;  %v1099_v44 = vmul.f32 %v1697_v14, %v2186_v32  ;;  %v2317_v49 = vpop.f32.mrf.mxu0  ;;  %v1491_v54 = vmul.f32 -1.442695, %v2321_v7 }
 0x145   : > { %v1701_v23 = vpop.eup %1700  ;;  %1726 = vpow2.f32 %v1479_v46  ;;  %v1101_v21 = vmul.f32 %v1699_v48, %v2189_v37  ;;  %v1488_v59 = vmul.f32 -1.442695, %v2306_v22  ;;  %v2325_v37 = vpop.f32.mrf.mxu1 }
 0x146   : > { %v1703_v35 = vpop.eup %1702  ;;  %v1100_v60 = vmul.f32 %v1701_v23, %v2192_v40  ;;  %1728 = vpow2.f32 %v1480_v63  ;;  %v1180_v12 = vadd.f32 %v1179_v45, %v1097_v20  ;;  %v2330_v51 = vpop.f32.mrf.mxu0 }
 0x147   : > { %v1705_v33 = vpop.eup %1704  ;;  %1730 = vpow2.f32 %v1482_v5  ;;  %v1102_v28 = vmul.f32 %v1703_v35, %v2195_v47  ;;  %v1490_v5 = vmul.f32 -1.442695, %v2308_v36  ;;  %v1489_v47 = vmul.f32 -1.442695, %v2314_v27  ;;  %v2336_v20 = vpop.f32.mrf.mxu1 }
 0x148   : > { %v1707_v39 = vpop.eup %1706  ;;  %v1184_v43 = vadd.f32 %v1100_v60, %v1099_v44  ;;  %1732 = vpow2.f32 %v1481_v8  ;;  %v1181_v32 = vadd.f32 %v1180_v12, %v1098_v50  ;;  %v1103_v24 = vmul.f32 %v1705_v33, %v2198_v42  ;;  %v567_v23 = vpop.f32.mrf.mxu0 }
 0x149   : > { %v1709_v40 = vpop.eup %1708  ;;  %1734 = vpow2.f32 %v1483_v34  ;;  %v1105_v19 = vmul.f32 %v1707_v39, %v2201_v55  ;;  %v680_v15 = vpop.f32.mrf.mxu1 }
 0x14a   : > { %v1711_v46 = vpop.eup %1710  ;;  %v1104_v26 = vmul.f32 %v1709_v40, %v2206_v56  ;;  %1736 = vpow2.f32 %v1484_v29  ;;  %1182 = vadd.xlane.f32.xlu1 %v1181_v32  ;;  %v1185_v61 = vadd.f32 %v1184_v43, %v1101_v21  ;;  %v569_v39 = vpop.f32.mrf.mxu0 }
 0x14b   : > { %v1713_v63 = vpop.eup %1712  ;;  %1738 = vpow2.f32 %v1486_v18  ;;  %v1106_v34 = vmul.f32 %v1711_v46, %v2209_v3  ;;  %v347_v46 = vpop.permute.xlu0 %346 }
 0x14c   : > { %v1715_v8 = vpop.eup %1714  ;;  %v1189_v6 = vadd.f32 %v1104_v26, %v1103_v24  ;;  %1740 = vpow2.f32 %v1485_v58  ;;  %v1186_v42 = vadd.f32 %v1185_v61, %v1102_v28  ;;  %v1107_v29 = vmul.f32 %v1713_v63, %v2213_v10 }
 0x14d   : > { %v1717_v56 = vpop.eup %1716  ;;  %1742 = vpow2.f32 %v1487_v4  ;;  %v1109_v9 = vmul.f32 %v1715_v8, %v2216_v17  ;;  %v2341_v63 = vadd.f32 %v2317_v49, %v347_v46  ;;  %v352_v49 = vpop.permute.xlu1 %351 }
 0x14e   : > { %v1719_v14 = vpop.eup %1718  ;;  %v1108_v48 = vmul.f32 %v1717_v56, %v2222_v52  ;;  %1744 = vpow2.f32 %v1488_v59  ;;  %1187 = vadd.xlane.f32.xlu0 %v1186_v42  ;;  %v1190_v55 = vadd.f32 %v1189_v6, %v1105_v19  ;;  %v2344_v42 = vadd.f32 %v2325_v37, %v347_v46 }
 0x14f   : > { %v1721_v45 = vpop.eup %1720  ;;  %1746 = vpow2.f32 %v1490_v5  ;;  %v1110_v52 = vmul.f32 %v1719_v14, %v2225_v31  ;;  %v682_v31 = vpop.f32.mrf.mxu1  ;;  %v2347_v14 = vadd.f32 %v2330_v51, %v347_v46 }
 0x150   : > { %v1723_v18 = vpop.eup %1722  ;;  %v1194_v25 = vadd.f32 %v1108_v48, %v1107_v29  ;;  %v919_v3 = vadd.f32 1.0, %v1721_v45  ;;  %1748 = vpow2.f32 %v1489_v47  ;;  %v1191_v50 = vadd.f32 %v1190_v55, %v1106_v34  ;;  %v573_v5 = vpop.f32.mrf.mxu0 }
 0x151   : > { %v1725_v35 = vpop.eup %1724  ;;  %v921_v44 = vadd.f32 1.0, %v1723_v18  ;;  %1750 = vpow2.f32 %v1491_v54  ;;  %v686_v56 = vpop.f32.mrf.mxu1  ;;  %v1492_v55 = vmul.f32 -1.442695, %v2341_v63  ;;  %v2351_v45 = vadd.f32 %v2336_v20, %v347_v46 }
 0x152   : > { %v1727_v10 = vpop.eup %1726  ;;  %1752 = vrcp.f32 %v919_v3  ;;  %v920_v60 = vadd.f32 1.0, %v1725_v35  ;;  %1192 = vadd.xlane.f32.xlu1 %v1191_v50  ;;  %v1195_v12 = vadd.f32 %v1194_v25, %v1109_v9  ;;  %v575_v9 = vpop.f32.mrf.mxu0  ;;  %v2353_v25 = vadd.f32 %v567_v23, %v352_v49 }
 0x153   : > { %v1729_v33 = vpop.eup %1728  ;;  %1754 = vrcp.f32 %v921_v44  ;;  %v922_v17 = vadd.f32 1.0, %v1727_v10  ;;  %v2355_v3 = vadd.f32 %v680_v15, %v352_v49  ;;  %v357_v51 = vpop.permute.xlu0 %356  ;;  %v1494_v44 = vmul.f32 -1.442695, %v2344_v42 }
 0x154   : > { %v1731_v58 = vpop.eup %1730  ;;  %1756 = vrcp.f32 %v920_v60  ;;  %v923_v4 = vadd.f32 1.0, %v1729_v33  ;;  %v1196_v21 = vadd.f32 %v1195_v12, %v1110_v52  ;;  %v2358_v10 = vadd.f32 %v569_v39, %v352_v49  ;;  %v688_v52 = vpop.f32.mrf.mxu1 }
 0x155   : > { %v1733_v43 = vpop.eup %1732  ;;  %1758 = vrcp.f32 %v922_v17  ;;  %v925_v32 = vadd.f32 1.0, %v1731_v58  ;;  %v2360_v12 = vadd.f32 %v682_v31, %v352_v49  ;;  %v2362_v33 = vadd.f32 %v573_v5, %v357_v51 }
 0x156   : > { %v1735_v40 = vpop.eup %1734  ;;  %1760 = vrcp.f32 %v923_v4  ;;  %v924_v28 = vadd.f32 1.0, %v1733_v43  ;;  %1197 = vadd.xlane.f32.xlu0 %v1196_v21  ;;  %v1493_v15 = vmul.f32 -1.442695, %v2347_v14  ;;  %v1495_v17 = vmul.f32 -1.442695, %v2351_v45  ;;  %v577_v4 = vpop.f32.mrf.mxu0 }
 0x157   : > { %v1737_v59 = vpop.eup %1736  ;;  %1762 = vrcp.f32 %v925_v32  ;;  %v926_v24 = vadd.f32 1.0, %v1735_v40  ;;  %v2366_v58 = vadd.f32 %v686_v56, %v357_v51  ;;  %v1496_v39 = vmul.f32 -1.442695, %v2353_v25  ;;  %v690_v46 = vpop.f32.mrf.mxu1 }
 0x158   : > { %v1739_v26 = vpop.eup %1738  ;;  %1764 = vrcp.f32 %v924_v28  ;;  %v927_v61 = vadd.f32 1.0, %v1737_v59  ;;  %v1498_v43 = vmul.f32 -1.442695, %v2355_v3  ;;  %v2370_v32 = vadd.f32 %v575_v9, %v357_v51 }
 0x159   : > { %v1741_v47 = vpop.eup %1740  ;;  %1766 = vrcp.f32 %v926_v24  ;;  %v929_v8 = vadd.f32 1.0, %v1739_v26  ;;  %v1497_v59 = vmul.f32 -1.442695, %v2358_v10  ;;  %v1499_v26 = vmul.f32 -1.442695, %v2360_v12 }
 0x15a   : > { %v1743_v19 = vpop.eup %1742  ;;  %1768 = vrcp.f32 %v927_v61  ;;  %v928_v6 = vadd.f32 1.0, %v1741_v47  ;;  %v1500_v61 = vmul.f32 -1.442695, %v2362_v33  ;;  %v2377_v5 = vadd.f32 %v688_v52, %v357_v51 }
 0x15b   : > { %v1745_v34 = vpop.eup %1744  ;;  %1770 = vrcp.f32 %v929_v8  ;;  %v930_v54 = vadd.f32 1.0, %v1743_v19  ;;  %v362_v19 = vpop.permute.xlu1 %361 }
 0x15c   : > { %v1747_v29 = vpop.eup %1746  ;;  %1772 = vrcp.f32 %v928_v6  ;;  %v931_v48 = vadd.f32 1.0, %v1745_v34 }
 0x15d   : > { %v1749_v18 = vpop.eup %1748  ;;  %1774 = vrcp.f32 %v930_v54  ;;  %v933_v37 = vadd.f32 1.0, %v1747_v29  ;;  %v1501_v54 = vmul.f32 -1.442695, %v2370_v32  ;;  %v2383_v29 = vadd.f32 %v577_v4, %v362_v19 }
 0x15e   : > { %v1751_v50 = vpop.eup %1750  ;;  %1776 = vrcp.f32 %v931_v48  ;;  %v932_v35 = vadd.f32 1.0, %v1749_v18 }
 0x15f   : > { %v1753_v60 = vpop.eup %1752  ;;  %1778 = vrcp.f32 %v933_v37  ;;  %v934_v20 = vadd.f32 1.0, %v1751_v50  ;;  %v1503_v37 = vmul.f32 -1.442695, %v2377_v5  ;;  %v2388_v50 = vadd.f32 %v690_v46, %v362_v19 }
 0x160   : > { %v1755_v23 = vpop.eup %1754  ;;  %1780 = vrcp.f32 %v932_v35  ;;  %v1111_v28 = vmul.f32 %v1753_v60, %v2254_v57  ;;  %v1502_v57 = vmul.f32 -1.442695, %v2366_v58  ;;  %v1504_v60 = vmul.f32 -1.442695, %v2383_v29 }
 0x161   : > { %v1757_v21 = vpop.eup %1756  ;;  %1782 = vrcp.f32 %v934_v20  ;;  %v1113_v8 = vmul.f32 %v1755_v23, %v2259_v2  ;;  %v692_v2 = vpop.f32.mrf.mxu1 }
 0x162   : > { %v1759_v40 = vpop.eup %1758  ;;  %v1112_v31 = vmul.f32 %v1757_v21, %v2267_v11  ;;  %1784 = vpow2.f32 %v1492_v55  ;;  %v579_v11 = vpop.f32.mrf.mxu0  ;;  %v2395_v20 = vadd.f32 %v692_v2, %v362_v19  ;;  %v1506_v21 = vmul.f32 -1.442695, %v2388_v50 }
 0x163   : > { %v1761_v24 = vpop.eup %1760  ;;  %1786 = vpow2.f32 %v1494_v44  ;;  %v1114_v34 = vmul.f32 %v1759_v40, %v2271_v13  ;;  %v2390_v13 = vadd.f32 %v579_v11, %v362_v19 }
 0x164   : > { %v1763_v47 = vpop.eup %1762  ;;  %v1199_v6 = vadd.f32 %v1112_v31, %v1111_v28  ;;  %1788 = vpow2.f32 %v1493_v15  ;;  %v1115_v48 = vmul.f32 %v1761_v24, %v2274_v30 }
 0x165   : > { %v1765_v56 = vpop.eup %1764  ;;  %1790 = vpow2.f32 %v1495_v17  ;;  %v1117_v35 = vmul.f32 %v1763_v47, %v2278_v41 }
 0x166   : > { %v1767_v49 = vpop.eup %1766  ;;  %v1116_v55 = vmul.f32 %v1765_v56, %v2280_v1  ;;  %1792 = vpow2.f32 %v1496_v39  ;;  %v1200_v9 = vadd.f32 %v1199_v6, %v1113_v8  ;;  %v1505_v39 = vmul.f32 -1.442695, %v2390_v13 }
 0x167   : > { %v1769_v18 = vpop.eup %1768  ;;  %1794 = vpow2.f32 %v1498_v43  ;;  %v1118_v1 = vmul.f32 %v1767_v49, %v2282_v62 }
 0x168   : > { %v1771_v51 = vpop.eup %1770  ;;  %v1204_v44 = vadd.f32 %v1116_v55, %v1115_v48  ;;  %1796 = vpow2.f32 %v1497_v59  ;;  %v1201_v52 = vadd.f32 %v1200_v9, %v1114_v34  ;;  %v1119_v15 = vmul.f32 %v1769_v18, %v2287_v0 }
 0x169   : > { %v1773_v30 = vpop.eup %1772  ;;  %1798 = vpow2.f32 %v1499_v26  ;;  %v1121_v43 = vmul.f32 %v1771_v51, %v2290_v38 }
 0x16a   : > { %v1775_v23 = vpop.eup %1774  ;;  %v1120_v17 = vmul.f32 %v1773_v30, %v2299_v16  ;;  %1800 = vpow2.f32 %v1500_v61  ;;  %1202 = vadd.xlane.f32.xlu1 %v1201_v52  ;;  %v1205_v4 = vadd.f32 %v1204_v44, %v1117_v35  ;;  %v1507_v16 = vmul.f32 -1.442695, %v2395_v20 }
 0x16b   : > { %v1777_v41 = vpop.eup %1776  ;;  %1802 = vpow2.f32 %v1502_v57  ;;  %v1122_v0 = vmul.f32 %v1775_v23, %v2301_v53 }
 0x16c   : > { %v1779_v62 = vpop.eup %1778  ;;  %v1209_v40 = vadd.f32 %v1120_v17, %v1119_v15  ;;  %1804 = vpow2.f32 %v1501_v54  ;;  %v1206_v28 = vadd.f32 %v1205_v4, %v1118_v1  ;;  %v1123_v46 = vmul.f32 %v1777_v41, %v2306_v22 }
 0x16d   : > { %v1781_v31 = vpop.eup %1780  ;;  %1806 = vpow2.f32 %v1503_v37  ;;  %v1125_v38 = vmul.f32 %v1779_v62, %v2308_v36 }
 0x16e   : > { %v1783_v59 = vpop.eup %1782  ;;  %v1124_v24 = vmul.f32 %v1781_v31, %v2314_v27  ;;  %1808 = vpow2.f32 %v1504_v60  ;;  %1207 = vadd.xlane.f32.xlu0 %v1206_v28  ;;  %v1210_v26 = vadd.f32 %v1209_v40, %v1121_v43 }
 0x16f   : > { %v1785_v61 = vpop.eup %1784  ;;  %1810 = vpow2.f32 %v1506_v21  ;;  %v1126_v22 = vmul.f32 %v1783_v59, %v2321_v7 }
 0x170   : > { %v1787_v47 = vpop.eup %1786  ;;  %v1214_v8 = vadd.f32 %v1124_v24, %v1123_v46  ;;  %v935_v19 = vadd.f32 1.0, %v1785_v61  ;;  %1812 = vpow2.f32 %v1505_v39  ;;  %v1211_v53 = vadd.f32 %v1210_v26, %v1122_v0 }
 0x171   : > { %v1789_v6 = vpop.eup %1788  ;;  %v937_v57 = vadd.f32 1.0, %v1787_v47  ;;  %1814 = vpow2.f32 %v1507_v16 }
 0x172   : > { %v1791_v11 = vpop.eup %1790  ;;  %1816 = vrcp.f32 %v935_v19  ;;  %v936_v27 = vadd.f32 1.0, %v1789_v6  ;;  %1212 = vadd.xlane.f32.xlu1 %v1211_v53  ;;  %v1215_v56 = vadd.f32 %v1214_v8, %v1125_v38 }
 0x173   : > { %v1793_v34 = vpop.eup %1792  ;;  %1818 = vrcp.f32 %v937_v57  ;;  %v938_v54 = vadd.f32 1.0, %v1791_v11 }
 0x174   : > { %v1795_v36 = vpop.eup %1794  ;;  %1820 = vrcp.f32 %v936_v27  ;;  %v939_v49 = vadd.f32 1.0, %v1793_v34  ;;  %v1216_v48 = vadd.f32 %v1215_v56, %v1126_v22 }
 0x175   : > { %v1797_v55 = vpop.eup %1796  ;;  %1822 = vrcp.f32 %v938_v54  ;;  %v941_v2 = vadd.f32 1.0, %v1795_v36 }
 0x176   : > { %v1799_v9 = vpop.eup %1798  ;;  %1824 = vrcp.f32 %v939_v49  ;;  %v940_v18 = vadd.f32 1.0, %v1797_v55  ;;  %1217 = vadd.xlane.f32.xlu0 %v1216_v48 }
 0x177   : > { %v1801_v37 = vpop.eup %1800  ;;  %1826 = vrcp.f32 %v941_v2  ;;  %v942_v7 = vadd.f32 1.0, %v1799_v9 }
 0x178   : > { %v1803_v51 = vpop.eup %1802  ;;  %1828 = vrcp.f32 %v940_v18  ;;  %v943_v35 = vadd.f32 1.0, %v1801_v37 }
 0x179   : > { %v1805_v44 = vpop.eup %1804  ;;  %1830 = vrcp.f32 %v942_v7  ;;  %v945_v52 = vadd.f32 1.0, %v1803_v51  ;;  %v1143_v51 = vld [vmem:[#allocation2] sm:$0xff] }
 0x17a   : > { %v1807_v30 = vpop.eup %1806  ;;  %1832 = vrcp.f32 %v943_v35  ;;  %v944_v1 = vadd.f32 1.0, %v1805_v44 }
 0x17b   : > { %v1809_v60 = vpop.eup %1808  ;;  %1834 = vrcp.f32 %v945_v52  ;;  %v946_v23 = vadd.f32 1.0, %v1807_v30  ;;  %v1145_v52 = vld [vmem:[#allocation2 + $0x10] sm:$0xff] }
 0x17c   : > { %v1811_v15 = vpop.eup %1810  ;;  %1836 = vrcp.f32 %v944_v1  ;;  %v947_v17 = vadd.f32 1.0, %v1809_v60 }
 0x17d   : > { %v1813_v4 = vpop.eup %1812  ;;  %1838 = vrcp.f32 %v946_v23  ;;  %v949_v41 = vadd.f32 1.0, %v1811_v15  ;;  %v1147_v23 = vld [vmem:[#allocation2 + $0x20] sm:$0xff] }
 0x17e   : > { %v1815_v21 = vpop.eup %1814  ;;  %1840 = vrcp.f32 %v947_v17  ;;  %v948_v39 = vadd.f32 1.0, %v1813_v4  ;;  %v1148_v4 = vld [vmem:[#allocation2 + $0x28] sm:$0xff] }
 0x17f   : > { %v1817_v62 = vpop.eup %1816  ;;  %1842 = vrcp.f32 %v949_v41  ;;  %v950_v43 = vadd.f32 1.0, %v1815_v21 }
 0x180   : > { %v1819_v40 = vpop.eup %1818  ;;  %1844 = vrcp.f32 %v948_v39  ;;  %v1127_v0 = vmul.f32 %v1817_v62, %v2341_v63  ;;  %v1149_v39 = vld [vmem:[#allocation2 + $0x30] sm:$0xff] }
 0x181   : > { %v1821_v28 = vpop.eup %1820  ;;  %1846 = vrcp.f32 %v950_v43  ;;  %v1129_v24 = vmul.f32 %v1819_v40, %v2344_v42  ;;  %v1150_v40 = vld [vmem:[#allocation2 + $0x38] sm:$0xff] }
 0x182   : > { %v1823_v31 = vpop.eup %1822  ;;  %v1128_v16 = vmul.f32 %v1821_v28, %v2347_v14 }
 0x183   : > { %v1825_v59 = vpop.eup %1824  ;;  %v1130_v47 = vmul.f32 %v1823_v31, %v2351_v45 }
 0x184   : > { %v1827_v46 = vpop.eup %1826  ;;  %v1219_v26 = vadd.f32 %v1128_v16, %v1127_v0  ;;  %v1131_v8 = vmul.f32 %v1825_v59, %v2353_v25  ;;  %v1151_v0 = vld [vmem:[#allocation2 + $0x40] sm:$0xff] }
 0x185   : > { %v1829_v61 = vpop.eup %1828  ;;  %v1133_v63 = vmul.f32 %v1827_v46, %v2355_v3  ;;  %v1152_v46 = vld [vmem:[#allocation2 + $0x48] sm:$0xff] }
 0x186   : > { %v1831_v38 = vpop.eup %1830  ;;  %v1132_v19 = vmul.f32 %v1829_v61, %v2358_v10  ;;  %v1220_v53 = vadd.f32 %v1219_v26, %v1129_v24  ;;  %v1153_v61 = vld [vmem:[#allocation2 + $0x50] sm:$0xff] }
 0x187   : > { %v1833_v6 = vpop.eup %1832  ;;  %v1134_v42 = vmul.f32 %v1831_v38, %v2360_v12 }
 0x188   : > { %v1835_v57 = vpop.eup %1834  ;;  %v1224_v14 = vadd.f32 %v1132_v19, %v1131_v8  ;;  %v1221_v11 = vadd.f32 %v1220_v53, %v1130_v47  ;;  %v1135_v56 = vmul.f32 %v1833_v6, %v2362_v33  ;;  %v1154_v8 = vld [vmem:[#allocation2 + $0x58] sm:$0xff]  ;;  %v1155_v6 = vld [vmem:[#allocation2 + $0x60] sm:$0xff] }
 0x189   : > { %v1837_v22 = vpop.eup %1836  ;;  %v1137_v10 = vmul.f32 %v1835_v57, %v2366_v58 }
 0x18a   : > { %v1839_v27 = vpop.eup %1838  ;;  %v1136_v34 = vmul.f32 %v1837_v22, %v2370_v32  ;;  %1222 = vadd.xlane.f32.xlu1 %v1221_v11  ;;  %v1225_v45 = vadd.f32 %v1224_v14, %v1133_v63  ;;  %v1156_v14 = vld [vmem:[#allocation2 + $0x68] sm:$0xff] }
 0x18b   : > { %v1841_v25 = vpop.eup %1840  ;;  %v1138_v3 = vmul.f32 %v1839_v27, %v2377_v5  ;;  %v1157_v27 = vld [vmem:[#allocation2 + $0x70] sm:$0xff] }
 0x18c   : > { %v1843_v54 = vpop.eup %1842  ;;  %v1229_v36 = vadd.f32 %v1136_v34, %v1135_v56  ;;  %v1226_v49 = vadd.f32 %v1225_v45, %v1134_v42  ;;  %v1139_v55 = vmul.f32 %v1841_v25, %v2383_v29  ;;  %v1144_v29 = vld [vmem:[#allocation2 + $0x8] sm:$0xff]  ;;  %v1158_v34 = vld [vmem:[#allocation2 + $0x78] sm:$0xff] }
 0x18d   : > { %v1845_v48 = vpop.eup %1844  ;;  %v1141_v32 = vmul.f32 %v1843_v54, %v2388_v50 }
 0x18e   : > { %v1140_v2 = vmul.f32 %v1845_v48, %v2390_v13  ;;  %1227 = vadd.xlane.f32.xlu0 %v1226_v49  ;;  %v1230_v12 = vadd.f32 %v1229_v36, %v1137_v10  ;;  %v1847_v33 = vpop.eup %1846 }
 0x18f   : > { %v1142_v37 = vmul.f32 %v1847_v33, %v2395_v20  ;;  %v1146_v20 = vld [vmem:[#allocation2 + $0x18] sm:$0xff] }
 0x190   : > { %v1234_v9 = vadd.f32 %v1140_v2, %v1139_v55  ;;  %v1231_v18 = vadd.f32 %v1230_v12, %v1138_v3 }
 0x192   : > { %1232 = vadd.xlane.f32.xlu1 %v1231_v18  ;;  %v1235_v58 = vadd.f32 %v1234_v9, %v1141_v32 }
 0x194   : > { %v1236_v7 = vadd.f32 %v1235_v58, %v1142_v37 }
 0x196   : > { %1237 = vadd.xlane.f32.xlu0 %v1236_v7 }
 0x1b3   : > { %v1163_v5 = vpop.xlane.xlu0 %1162 }
 0x1b4   : > { %v1239_v35 = vadd.f32 %v1163_v5, %v1143_v51 }
 0x1b6   : > { %1256 = vst.msk [vmem:[#allocation2] sm:$0xff] %vm1255_vm2, %v1239_v35 }
 0x1bc   : > { %v1168_v13 = vpop.xlane.xlu1 %1167 }
 0x1bd   : > { %v1240_v44 = vadd.f32 %v1168_v13, %v1144_v29 }
 0x1bf   : > { %1257 = vst.msk [vmem:[#allocation2 + $0x8] sm:$0xff] %vm1255_vm2, %v1240_v44  ;;  %v1173_v50 = vpop.xlane.xlu0 %1172 }
 0x1c0   : > { %v1241_v30 = vadd.f32 %v1173_v50, %v1145_v52 }
 0x1c2   : > { %1258 = vst.msk [vmem:[#allocation2 + $0x10] sm:$0xff] %vm1255_vm2, %v1241_v30 }
 0x1c6   : > { %v1178_v1 = vpop.xlane.xlu0 %1177 }
 0x1c7   : > { %v1242_v60 = vadd.f32 %v1178_v1, %v1146_v20 }
 0x1c9   : > { %1259 = vst.msk [vmem:[#allocation2 + $0x18] sm:$0xff] %vm1255_vm2, %v1242_v60 }
 0x1d3   : > { %v1183_v15 = vpop.xlane.xlu1 %1182 }
 0x1d4   : > { %v1243_v17 = vadd.f32 %v1183_v15, %v1147_v23 }
 0x1d6   : > { %1260 = vst.msk [vmem:[#allocation2 + $0x20] sm:$0xff] %vm1255_vm2, %v1243_v17 }
 0x1d7   : > { %v1188_v41 = vpop.xlane.xlu0 %1187 }
 0x1d8   : > { %v1244_v21 = vadd.f32 %v1188_v41, %v1148_v4 }
 0x1da   : > { %1261 = vst.msk [vmem:[#allocation2 + $0x28] sm:$0xff] %vm1255_vm2, %v1244_v21 }
 0x1db   : > { %v1193_v62 = vpop.xlane.xlu1 %1192 }
 0x1dc   : > { %v1245_v43 = vadd.f32 %v1193_v62, %v1149_v39 }
 0x1de   : > { %1262 = vst.msk [vmem:[#allocation2 + $0x30] sm:$0xff] %vm1255_vm2, %v1245_v43 }
 0x1df   : > { %v1198_v28 = vpop.xlane.xlu0 %1197 }
 0x1e0   : > { %v1246_v31 = vadd.f32 %v1198_v28, %v1150_v40 }
 0x1e2   : > { %1263 = vst.msk [vmem:[#allocation2 + $0x38] sm:$0xff] %vm1255_vm2, %v1246_v31 }
 0x1f3   : > { %v1203_v16 = vpop.xlane.xlu1 %1202 }
 0x1f4   : > { %v1247_v59 = vadd.f32 %v1203_v16, %v1151_v0 }
 0x1f6   : > { %1264 = vst.msk [vmem:[#allocation2 + $0x40] sm:$0xff] %vm1255_vm2, %v1247_v59 }
 0x1f7   : > { %v1208_v24 = vpop.xlane.xlu0 %1207 }
 0x1f8   : > { %v1248_v26 = vadd.f32 %v1208_v24, %v1152_v46 }
 0x1fa   : > { %1265 = vst.msk [vmem:[#allocation2 + $0x48] sm:$0xff] %vm1255_vm2, %v1248_v26 }
 0x1fb   : > { %v1213_v38 = vpop.xlane.xlu1 %1212 }
 0x1fc   : > { %v1249_v47 = vadd.f32 %v1213_v38, %v1153_v61 }
 0x1fe   : > { %1266 = vst.msk [vmem:[#allocation2 + $0x50] sm:$0xff] %vm1255_vm2, %v1249_v47 }
 0x1ff   : > { %v1218_v19 = vpop.xlane.xlu0 %1217 }
 0x200   : > { %v1250_v53 = vadd.f32 %v1218_v19, %v1154_v8 }
 0x202   : > { %1267 = vst.msk [vmem:[#allocation2 + $0x58] sm:$0xff] %vm1255_vm2, %v1250_v53 }
 0x213   : > { %v1223_v57 = vpop.xlane.xlu1 %1222 }
 0x214   : > { %v1251_v63 = vadd.f32 %v1223_v57, %v1155_v6 }
 0x216   : > { %1268 = vst.msk [vmem:[#allocation2 + $0x60] sm:$0xff] %vm1255_vm2, %v1251_v63 }
 0x217   : > { %v1228_v11 = vpop.xlane.xlu0 %1227 }
 0x218   : > { %v1252_v22 = vadd.f32 %v1228_v11, %v1156_v14 }
 0x21a   : > { %1269 = vst.msk [vmem:[#allocation2 + $0x68] sm:$0xff] %vm1255_vm2, %v1252_v22 }
 0x21b   : > { %v1233_v42 = vpop.xlane.xlu1 %1232 }
 0x21c   : > { %v1253_v56 = vadd.f32 %v1233_v42, %v1157_v27 }
 0x21e   : > { %1270 = vst.msk [vmem:[#allocation2 + $0x70] sm:$0xff] %vm1255_vm2, %v1253_v56  ;;  %1275 = sbr.rel (%p1508_p12) target bundleno = 558 (0x22e), region = 63 }
 0x21f   : > { %v1238_v45 = vpop.xlane.xlu0 %1237 }
 0x220   : > { %v1254_v25 = vadd.f32 %v1238_v45, %v1158_v34 }
 0x222   : > { %1271 = vst.msk [vmem:[#allocation2 + $0x78] sm:$0xff] %vm1255_vm2, %v1254_v25 }
 0x223   : > { %v1276_v54 = vld [vmem:[#allocation2] sm:$0xff]  ;;  %v1277_v10 = vld [vmem:[#allocation2 + $0x8] sm:$0xff]  ;;  %v1278_v36 = vld [vmem:[#allocation2 + $0x10] sm:$0xff] }
 0x224   : > { %v1292_v49 = vmul.f32 0.0009765625, %v1276_v54  ;;  %v1293_v48 = vmul.f32 0.0009765625, %v1277_v10  ;;  %v1294_v3 = vmul.f32 0.0009765625, %v1278_v36  ;;  %v1279_v55 = vld [vmem:[#allocation2 + $0x18] sm:$0xff]  ;;  %v1280_v2 = vld [vmem:[#allocation2 + $0x20] sm:$0xff]  ;;  %v1281_v12 = vld [vmem:[#allocation2 + $0x28] sm:$0xff] }
 0x225   : > { %v1295_v33 = vmul.f32 0.0009765625, %v1279_v55  ;;  %v1296_v32 = vmul.f32 0.0009765625, %v1280_v2  ;;  %v1297_v9 = vmul.f32 0.0009765625, %v1281_v12  ;;  %v1282_v18 = vld [vmem:[#allocation2 + $0x30] sm:$0xff]  ;;  %v1283_v37 = vld [vmem:[#allocation2 + $0x38] sm:$0xff]  ;;  %v1284_v58 = vld [vmem:[#allocation2 + $0x40] sm:$0xff] }
 0x226   : > { %1308 = vst.msk [vmem:[%s1994_s23] sm:$0xff] %vm1255_vm2, %v1292_v49  ;;  %1309 = vst.msk [vmem:[%s1994_s23 + $0x8] sm:$0xff] %vm1255_vm2, %v1293_v48  ;;  %v1298_v7 = vmul.f32 0.0009765625, %v1282_v18  ;;  %v1299_v51 = vmul.f32 0.0009765625, %v1283_v37  ;;  %v1300_v5 = vmul.f32 0.0009765625, %v1284_v58  ;;  %v1285_v35 = vld [vmem:[#allocation2 + $0x48] sm:$0xff] }
 0x227   : > { %1310 = vst.msk [vmem:[%s1994_s23 + $0x10] sm:$0xff] %vm1255_vm2, %v1294_v3  ;;  %v1286_v29 = vld [vmem:[#allocation2 + $0x50] sm:$0xff]  ;;  %v1287_v13 = vld [vmem:[#allocation2 + $0x58] sm:$0xff]  ;;  %1311 = vst.msk [vmem:[%s1994_s23 + $0x18] sm:$0xff] %vm1255_vm2, %v1295_v33  ;;  %v1301_v44 = vmul.f32 0.0009765625, %v1285_v35 }
 0x228   : > { %1312 = vst.msk [vmem:[%s1994_s23 + $0x20] sm:$0xff] %vm1255_vm2, %v1296_v32  ;;  %1313 = vst.msk [vmem:[%s1994_s23 + $0x28] sm:$0xff] %vm1255_vm2, %v1297_v9  ;;  %v1302_v52 = vmul.f32 0.0009765625, %v1286_v29  ;;  %v1303_v50 = vmul.f32 0.0009765625, %v1287_v13  ;;  %v1288_v30 = vld [vmem:[#allocation2 + $0x60] sm:$0xff]  ;;  %v1289_v20 = vld [vmem:[#allocation2 + $0x68] sm:$0xff] }
 0x229   : > { %v1290_v1 = vld [vmem:[#allocation2 + $0x70] sm:$0xff]  ;;  %1314 = vst.msk [vmem:[%s1994_s23 + $0x30] sm:$0xff] %vm1255_vm2, %v1298_v7  ;;  %1315 = vst.msk [vmem:[%s1994_s23 + $0x38] sm:$0xff] %vm1255_vm2, %v1299_v51  ;;  %v1304_v60 = vmul.f32 0.0009765625, %v1288_v30  ;;  %v1305_v23 = vmul.f32 0.0009765625, %v1289_v20  ;;  %v1291_v17 = vld [vmem:[#allocation2 + $0x78] sm:$0xff] }
 0x22a   : > { %1316 = vst.msk [vmem:[%s1994_s23 + $0x40] sm:$0xff] %vm1255_vm2, %v1300_v5  ;;  %v1306_v15 = vmul.f32 0.0009765625, %v1290_v1  ;;  %1317 = vst.msk [vmem:[%s1994_s23 + $0x48] sm:$0xff] %vm1255_vm2, %v1301_v44  ;;  %v1307_v4 = vmul.f32 0.0009765625, %v1291_v17 }
 0x22b   : > { %1318 = vst.msk [vmem:[%s1994_s23 + $0x50] sm:$0xff] %vm1255_vm2, %v1302_v52  ;;  %1319 = vst.msk [vmem:[%s1994_s23 + $0x58] sm:$0xff] %vm1255_vm2, %v1303_v50 }
 0x22c   : > { %1320 = vst.msk [vmem:[%s1994_s23 + $0x60] sm:$0xff] %vm1255_vm2, %v1304_v60  ;;  %1321 = vst.msk [vmem:[%s1994_s23 + $0x68] sm:$0xff] %vm1255_vm2, %v1305_v23 }
 0x22d   : > { %1322 = vst.msk [vmem:[%s1994_s23 + $0x70] sm:$0xff] %vm1255_vm2, %v1306_v15  ;;  %1323 = vst.msk [vmem:[%s1994_s23 + $0x78] sm:$0xff] %vm1255_vm2, %v1307_v4 }
 0x22e PF: > { %s13_s18 = sadd.s32 1, %s1902_s18   ;;  %s2498_s12 = smov %s1882_s13 }
 0x22f   : > { %p10_p13 = scmp.ge.s32.totalorder %s13_s18, 6   ;;  %s2499_s13 = smov %s1977_s25 }
 0x230   : > { %s2500_s14 = smov %s1894_s16  ;;  %s2501_s15 = smov %s1898_s17 }
 0x231   : > { %s2502_s16 = smov %s2505_s19  ;;  %s2503_s17 = smov %s2509_s20 }
 0x232   :  { %12 = sbr.rel (!%p10_p13) target bundleno = 4 (0x4), region = 98 }

</bundles_post_ra>
